<compile_context>
chip_gen: v6e
topology: v6e:2x2x1
jax: 0.10.0
libtpu: 0.0.40
codegen_flags: <defaults>
</compile_context>

<pallas_src>
import math
import functools

import jax
import jax.numpy as jnp
from jax.experimental import pallas as pl
from jax.experimental.pallas import tpu as pltpu

NEG_INF = -1e30
_VMEM_LIMIT = 64 * 1024 * 1024


def _fit(dim, target, align):
    """Largest tile <= target that divides dim and is a multiple of `align`; else full dim."""
    if dim <= target:
        return dim
    t = (target // align) * align
    while t >= align:
        if dim % t == 0:
            return t
        t -= align
    return dim


# ----------------------------- tiled matmul + bias (+ ReLU) -----------------------------

def _matmul_bias_kernel(x_ref, w_ref, b_ref, o_ref, acc_ref, *, activation):
    @pl.when(pl.program_id(2) == 0)
    def _():
        acc_ref[...] = jnp.zeros_like(acc_ref)

    acc_ref[...] += jnp.dot(x_ref[...], w_ref[...], preferred_element_type=jnp.float32)

    @pl.when(pl.program_id(2) == pl.num_programs(2) - 1)
    def _():
        r = acc_ref[...] + b_ref[...].astype(jnp.float32)
        if activation == "relu":
            r = jnp.maximum(r, 0.0)
        o_ref[...] = r.astype(o_ref.dtype)


def matmul_bias(x, w, b, activation=None, out_dtype=jnp.bfloat16,
                tm=256, tn=256, tk=512):
    """x: (M, K) @ w: (K, N) + b: (N,) -> (M, N). bf16 MXU operands, f32 accumulation."""
    M, K = x.shape
    Kw, N = w.shape
    assert K == Kw
    tm = _fit(M, tm, 8)
    tn = _fit(N, tn, 128)
    tk = _fit(K, tk, 128)
    grid = (M // tm, N // tn, K // tk)
    return pl.pallas_call(
        functools.partial(_matmul_bias_kernel, activation=activation),
        out_shape=jax.ShapeDtypeStruct((M, N), out_dtype),
        grid=grid,
        in_specs=[
            pl.BlockSpec((tm, tk), lambda i, j, k: (i, k)),
            pl.BlockSpec((tk, tn), lambda i, j, k: (k, j)),
            pl.BlockSpec((1, tn), lambda i, j, k: (0, j)),
        ],
        out_specs=pl.BlockSpec((tm, tn), lambda i, j, k: (i, j)),
        scratch_shapes=[pltpu.VMEM((tm, tn), jnp.float32)],
        compiler_params=pltpu.CompilerParams(
            dimension_semantics=("parallel", "parallel", "arbitrary"),
            vmem_limit_bytes=_VMEM_LIMIT),
    )(x, w, b.reshape(1, N))


# ----------------------------- (residual +) LayerNorm, tiled over rows -----------------------------

def _layernorm_kernel(*refs, eps, has_residual):
    if has_residual:
        x_ref, r_ref, g_ref, b_ref, o_ref = refs
        x = x_ref[...].astype(jnp.float32) + r_ref[...].astype(jnp.float32)
    else:
        x_ref, g_ref, b_ref, o_ref = refs
        x = x_ref[...].astype(jnp.float32)
    mean = jnp.mean(x, axis=-1, keepdims=True)
    var = jnp.mean(jnp.square(x - mean), axis=-1, keepdims=True)
    y = (x - mean) * jax.lax.rsqrt(var + eps)
    o_ref[...] = (y * g_ref[...].astype(jnp.float32)
                  + b_ref[...].astype(jnp.float32)).astype(o_ref.dtype)


def layernorm(x, g, b, residual=None, eps=1e-5, out_dtype=jnp.bfloat16, tm=512):
    M, D = x.shape
    tm = _fit(M, tm, 8)
    row_spec = pl.BlockSpec((tm, D), lambda i: (i, 0))
    vec_spec = pl.BlockSpec((1, D), lambda i: (0, 0))
    in_specs = [row_spec]
    args = [x]
    if residual is not None:
        in_specs.append(row_spec)
        args.append(residual)
    in_specs += [vec_spec, vec_spec]
    args += [g.reshape(1, D), b.reshape(1, D)]
    return pl.pallas_call(
        functools.partial(_layernorm_kernel, eps=eps, has_residual=residual is not None),
        out_shape=jax.ShapeDtypeStruct((M, D), out_dtype),
        grid=(M // tm,),
        in_specs=in_specs,
        out_specs=row_spec,
        compiler_params=pltpu.CompilerParams(dimension_semantics=("parallel",)),
    )(*args)


# ----------------------------- masked multi-head attention (per batch, all heads) -----------------------------

def _attention_kernel(qkv_ref, kpm_ref, o_ref, *, n_heads, d_head, scale):
    qkv = qkv_ref[...]                               # (S, 3D) bf16
    S = qkv.shape[0]
    D = n_heads * d_head
    kpm = kpm_ref[...].astype(jnp.float32)           # (1, S) additive 0 / -1e30

    # causal mask built in-kernel (no (B,S,S) HBM mask)
    row = jax.lax.broadcasted_iota(jnp.int32, (S, S), 0)
    col = jax.lax.broadcasted_iota(jnp.int32, (S, S), 1)
    bias = jnp.where(row >= col, 0.0, NEG_INF).astype(jnp.float32) + kpm   # (S, S)

    outs = []
    for h in range(n_heads):
        q = qkv[:, h * d_head:(h + 1) * d_head]
        k = qkv[:, D + h * d_head:D + (h + 1) * d_head]
        v = qkv[:, 2 * D + h * d_head:2 * D + (h + 1) * d_head]
        # contract last dims of both operands (no transpose materialization)
        s = jax.lax.dot_general(q, k, (((1,), (1,)), ((), ())),
                                preferred_element_type=jnp.float32) * scale + bias
        m = jnp.max(s, axis=-1, keepdims=True)
        p = jnp.exp(s - m)
        denom = jnp.sum(p, axis=-1, keepdims=True)
        p = p * pl.reciprocal(denom, approx=True)
        outs.append(jnp.dot(p.astype(qkv.dtype), v, preferred_element_type=jnp.float32))
    # one lane-dense store of all heads
    o_ref[...] = jnp.concatenate(outs, axis=-1).astype(o_ref.dtype)


def multihead_attention(qkv, kpm, n_heads):
    """qkv: (B, S, 3D) bf16 fused projections; kpm: (B, 1, S) additive key-padding bias."""
    B, S, threeD = qkv.shape
    D = threeD // 3
    d_head = D // n_heads
    scale = 1.0 / math.sqrt(d_head)
    # TODO(synk): for long S / v7x, switch to flash-style KV tiling with an online-softmax
    # accumulator instead of holding the full (S,S) score matrix in VMEM.
    return pl.pallas_call(
        functools.partial(_attention_kernel, n_heads=n_heads, d_head=d_head, scale=scale),
        out_shape=jax.ShapeDtypeStruct((B, S, D), jnp.bfloat16),
        grid=(B,),
        in_specs=[
            pl.BlockSpec((None, S, threeD), lambda b: (b, 0, 0)),
            pl.BlockSpec((None, 1, S), lambda b: (b, 0, 0)),
        ],
        out_specs=pl.BlockSpec((None, S, D), lambda b: (b, 0, 0)),
        compiler_params=pltpu.CompilerParams(
            dimension_semantics=("parallel",),
            vmem_limit_bytes=_VMEM_LIMIT),
    )(qkv, kpm)


# ----------------------------- cross-entropy (ignore_index), tiled over rows -----------------------------

def _ce_kernel(logits_ref, labels_ref, loss_ref, valid_ref, *, pad_id):
    @pl.when(pl.program_id(0) == 0)
    def _():
        loss_ref[...] = jnp.zeros_like(loss_ref)
        valid_ref[...] = jnp.zeros_like(valid_ref)

    x = logits_ref[...].astype(jnp.float32)                         # (tm, V)
    labels = labels_ref[...]                                        # (tm, 1) int32
    m = jnp.max(x, axis=-1, keepdims=True)
    lse = jnp.log(jnp.sum(jnp.exp(x - m), axis=-1, keepdims=True)) + m
    col = jax.lax.broadcasted_iota(jnp.int32, x.shape, 1)
    picked = jnp.sum(jnp.where(col == labels, x, 0.0), axis=-1, keepdims=True)
    valid = (labels != pad_id).astype(jnp.float32)
    loss_ref[...] = loss_ref[...] + jnp.sum((lse - picked) * valid)
    valid_ref[...] = valid_ref[...] + jnp.sum(valid)


def cross_entropy(logits, labels, pad_id, tm=512):
    """Mean cross-entropy over non-pad targets (CrossEntropyLoss(ignore_index=pad_id))."""
    N, V = logits.shape
    tm = _fit(N, tm, 8)
    labels2 = labels.reshape(N, 1).astype(jnp.int32)
    # TODO(synk): for very large vocabularies, additionally tile the vocab axis with an
    # online logsumexp accumulator (or fuse CE into the Wout matmul epilogue).
    loss_sum, valid_sum = pl.pallas_call(
        functools.partial(_ce_kernel, pad_id=pad_id),
        out_shape=(jax.ShapeDtypeStruct((1, 1), jnp.float32),
                   jax.ShapeDtypeStruct((1, 1), jnp.float32)),
        grid=(N // tm,),
        in_specs=[
            pl.BlockSpec((tm, V), lambda i: (i, 0)),
            pl.BlockSpec((tm, 1), lambda i: (i, 0)),
        ],
        out_specs=(pl.BlockSpec((1, 1), lambda i: (0, 0)),
                   pl.BlockSpec((1, 1), lambda i: (0, 0))),
        compiler_params=pltpu.CompilerParams(dimension_semantics=("arbitrary",)),
    )(logits, labels2)
    return loss_sum[0, 0] / jnp.maximum(valid_sum[0, 0], 1.0)


# ----------------------------- model (glue) -----------------------------

def init_params(seed, vocab, d_model, n_layers, d_ff, max_seq):
    key = jax.random.PRNGKey(seed)

    def nxt():
        nonlocal key
        key, sub = jax.random.split(key)
        return sub

    wdt = jnp.bfloat16  # MXU weight storage
    p = {}
    p["emb"] = jax.random.normal(nxt(), (vocab, d_model), jnp.float32) * 0.02

    # sinusoidal positional encoding buffer (deterministic, as in PositionalEncoding)
    position = jnp.arange(max_seq, dtype=jnp.float32)[:, None]
    div_term = jnp.exp(jnp.arange(0, d_model, 2, dtype=jnp.float32)
                       * (-math.log(10000.0) / d_model))
    pe = jnp.zeros((max_seq, d_model), jnp.float32)
    pe = pe.at[:, 0::2].set(jnp.sin(position * div_term))
    pe = pe.at[:, 1::2].set(jnp.cos(position * div_term))
    p["pe"] = pe

    layers = []
    for _ in range(n_layers):
        l = {}
        # fused QKV projection (matches PyTorch MHA's single in_proj weight)
        l["wqkv"] = (jax.random.normal(nxt(), (d_model, 3 * d_model), jnp.float32) * 0.02).astype(wdt)
        l["bqkv"] = jnp.zeros((3 * d_model,), jnp.float32)
        for name, (fi, fo) in dict(wo=(d_model, d_model),
                                   w1=(d_model, d_ff),
                                   w2=(d_ff, d_model)).items():
            l[name] = (jax.random.normal(nxt(), (fi, fo), jnp.float32) * 0.02).astype(wdt)
            l["b" + name[1:]] = jnp.zeros((fo,), jnp.float32)
        l["ln1_g"] = jnp.ones((d_model,), jnp.float32)
        l["ln1_b"] = jnp.zeros((d_model,), jnp.float32)
        l["ln2_g"] = jnp.ones((d_model,), jnp.float32)
        l["ln2_b"] = jnp.zeros((d_model,), jnp.float32)
        layers.append(l)
    p["layers"] = layers

    # final encoder LayerNorm (nn.Transformer's encoder_norm)
    p["ln_f_g"] = jnp.ones((d_model,), jnp.float32)
    p["ln_f_b"] = jnp.zeros((d_model,), jnp.float32)
    # Wout: d_model -> vocab
    p["wout"] = (jax.random.normal(nxt(), (d_model, vocab), jnp.float32) * 0.02).astype(wdt)
    p["bout"] = jnp.zeros((vocab,), jnp.float32)
    return p


def music_transformer_forward(params, input_ids, labels, attention_mask, n_heads, pad_id):
    B, S = input_ids.shape
    V, D = params["emb"].shape

    # embedding + positional encoding (dropout = identity in eval mode)
    x = params["emb"][input_ids] + params["pe"][:S][None, :, :]      # (B, S, D) f32
    x2d = x.reshape(B * S, D).astype(jnp.bfloat16)                   # bf16 residual stream

    # key padding mask: True = padded token (PyTorch key_padding_mask semantics)
    kpm = jnp.where(attention_mask, NEG_INF, 0.0).astype(jnp.float32).reshape(B, 1, S)

    # post-LN TransformerEncoderLayer x n_layers (DummyDecoder returns encoder memory)
    for l in params["layers"]:
        qkv = matmul_bias(x2d, l["wqkv"], l["bqkv"])                 # (B*S, 3D) bf16, fused QKV
        attn = multihead_attention(qkv.reshape(B, S, 3 * D), kpm, n_heads)   # (B, S, D) bf16
        attn_out = matmul_bias(attn.reshape(B * S, D), l["wo"], l["bo"])
        x2d = layernorm(x2d, l["ln1_g"], l["ln1_b"], residual=attn_out)      # LN(x + attn)
        ff = matmul_bias(x2d, l["w1"], l["b1"], activation="relu")
        ff = matmul_bias(ff, l["w2"], l["b2"])
        x2d = layernorm(x2d, l["ln2_g"], l["ln2_b"], residual=ff)            # LN(x + ff)

    # final encoder LayerNorm (from nn.Transformer)
    x2d = layernorm(x2d, params["ln_f_g"], params["ln_f_b"])

    # output projection + cross-entropy (ignore_index=pad_id)
    logits2d = matmul_bias(x2d, params["wout"], params["bout"], out_dtype=jnp.float32)
    logits = logits2d.reshape(B, S, V)
    loss = cross_entropy(logits2d, labels.reshape(-1), pad_id)
    return loss, logits

    # TODO(synk): generate() (autoregressive sampling / top-k beam) is host-side control
    # flow around forward(); not implemented as a kernel.


# ----------------------------- demo -----------------------------

if __name__ == "__main__":
    VOCAB = 40
    D_MODEL = 32
    N_HEADS = 4
    N_LAYERS = 2
    D_FF = 64
    MAX_SEQ = 64
    PAD_ID = 0
    B, S = 2, 8

    params = init_params(0, VOCAB, D_MODEL, N_LAYERS, D_FF, MAX_SEQ)

    key = jax.random.PRNGKey(0)
    k1, k2 = jax.random.split(key)
    input_ids = jax.random.randint(k1, (B, S), 1, VOCAB, dtype=jnp.int32)
    labels = jax.random.randint(k2, (B, S), 1, VOCAB, dtype=jnp.int32)
    # True = padding position (PyTorch src_key_padding_mask semantics); no padding here.
    attention_mask = jnp.zeros((B, S), dtype=bool)

    @jax.jit
    def run(params, input_ids, labels, attention_mask):
        return music_transformer_forward(params, input_ids, labels, attention_mask,
                                         N_HEADS, PAD_ID)

    loss, logits = run(params, input_ids, labels, attention_mask)
    jax.block_until_ready((loss, logits))

    assert logits.shape == (B, S, VOCAB)
    assert loss.shape == ()
    assert bool(jnp.isfinite(loss))
    print("KERNEL_OK")
</pallas_src>

<mosaic_0001>
module attributes {stable_mosaic.version = 11 : i64} {
  func.func @_matmul_bias_kernel(%arg0: i32, %arg1: i32, %arg2: i32, %arg3: memref<16x32xbf16, #tpu.memory_space<vmem>>, %arg4: memref<32x96xbf16, #tpu.memory_space<vmem>>, %arg5: memref<1x96xf32, #tpu.memory_space<vmem>>, %arg6: memref<16x96xbf16, #tpu.memory_space<vmem>>, %arg7: memref<16x96xf32, #tpu.memory_space<vmem>>) attributes {dimension_semantics = [#tpu.dimension_semantics<parallel>, #tpu.dimension_semantics<parallel>, #tpu.dimension_semantics<arbitrary>], iteration_bounds = array<i64: 1, 1, 1>, scalar_prefetch = 0 : i64, scratch_operands = 1 : i64, tpu.core_type = #tpu.core_type<tc>, window_params = [{transform_indices = @transform_0, window_bounds = array<i64: 16, 32>}, {transform_indices = @transform_1, window_bounds = array<i64: 32, 96>}, {transform_indices = @transform_2, window_bounds = array<i64: 1, 96>}, {transform_indices = @transform_3, window_bounds = array<i64: 16, 96>}]} {
    %c0_i32 = arith.constant 0 : i32
    %0 = arith.cmpi eq, %arg2, %c0_i32 : i32
    %1 = arith.extui %0 : i1 to i32
    %c0_i32_0 = arith.constant 0 : i32
    %2 = arith.cmpi ne, %1, %c0_i32_0 : i32
    scf.if %2 {
      %cst_10 = arith.constant 0.000000e+00 : f32
      %12 = vector.broadcast %cst_10 : f32 to vector<16x96xf32>
      %c0_11 = arith.constant 0 : index
      %c0_12 = arith.constant 0 : index
      %13 = vector.load %arg7[%c0_11, %c0_12] : memref<16x96xf32, #tpu.memory_space<vmem>>, vector<16x96xf32>
      tpu.vector_store %arg7[%c0_11, %c0_12], %12 {strides = array<i32>} : memref<16x96xf32, #tpu.memory_space<vmem>>, vector<16x96xf32>,
    } else {
    }
    %c0 = arith.constant 0 : index
    %c0_1 = arith.constant 0 : index
    %3 = vector.load %arg7[%c0, %c0_1] : memref<16x96xf32, #tpu.memory_space<vmem>>, vector<16x96xf32>
    %c0_2 = arith.constant 0 : index
    %c0_3 = arith.constant 0 : index
    %4 = vector.load %arg3[%c0_2, %c0_3] : memref<16x32xbf16, #tpu.memory_space<vmem>>, vector<16x32xbf16>
    %c0_4 = arith.constant 0 : index
    %c0_5 = arith.constant 0 : index
    %5 = vector.load %arg4[%c0_4, %c0_5] : memref<32x96xbf16, #tpu.memory_space<vmem>>, vector<32x96xbf16>
    %cst = arith.constant dense<0.000000e+00> : vector<16x96xf32>
    %6 = tpu.matmul %4, %5, %cst {dimension_numbers = #tpu.dot_dimension_numbers<[1], [0], [0], [1], [0, 0, 1, 1], [], []>} : vector<16x32xbf16>, vector<32x96xbf16>, vector<16x96xf32> -> vector<16x96xf32>
    %7 = arith.addf %3, %6 : vector<16x96xf32>
    %c0_6 = arith.constant 0 : index
    %c0_7 = arith.constant 0 : index
    %8 = vector.load %arg7[%c0_6, %c0_7] : memref<16x96xf32, #tpu.memory_space<vmem>>, vector<16x96xf32>
    tpu.vector_store %arg7[%c0_6, %c0_7], %7 {strides = array<i32>} : memref<16x96xf32, #tpu.memory_space<vmem>>, vector<16x96xf32>,
    %c0_i32_8 = arith.constant 0 : i32
    %9 = arith.cmpi eq, %arg2, %c0_i32_8 : i32
    %10 = arith.extui %9 : i1 to i32
    %c0_i32_9 = arith.constant 0 : i32
    %11 = arith.cmpi ne, %10, %c0_i32_9 : i32
    scf.if %11 {
      %c0_10 = arith.constant 0 : index
      %c0_11 = arith.constant 0 : index
      %12 = vector.load %arg7[%c0_10, %c0_11] : memref<16x96xf32, #tpu.memory_space<vmem>>, vector<16x96xf32>
      %c0_12 = arith.constant 0 : index
      %c0_13 = arith.constant 0 : index
      %13 = vector.load %arg5[%c0_12, %c0_13] : memref<1x96xf32, #tpu.memory_space<vmem>>, vector<1x96xf32>
      %14 = vector.broadcast %13 : vector<1x96xf32> to vector<16x96xf32>
      %15 = arith.addf %12, %14 : vector<16x96xf32>
      %16 = arith.truncf %15 : vector<16x96xf32> to vector<16x96xbf16>
      %c0_14 = arith.constant 0 : index
      %c0_15 = arith.constant 0 : index
      %17 = vector.load %arg6[%c0_14, %c0_15] : memref<16x96xbf16, #tpu.memory_space<vmem>>, vector<16x96xbf16>
      tpu.vector_store %arg6[%c0_14, %c0_15], %16 {strides = array<i32>} : memref<16x96xbf16, #tpu.memory_space<vmem>>, vector<16x96xbf16>,
    } else {
    }
    return
  }
  func.func @transform_0(%arg0: i32, %arg1: i32, %arg2: i32) -> (i32, i32) {
    %c0_i32 = arith.constant 0 : i32
    return %arg0, %arg2 : i32, i32
  }
  func.func @transform_1(%arg0: i32, %arg1: i32, %arg2: i32) -> (i32, i32) {
    %c0_i32 = arith.constant 0 : i32
    return %arg2, %arg1 : i32, i32
  }
  func.func @transform_2(%arg0: i32, %arg1: i32, %arg2: i32) -> (i32, i32) {
    %c0_i32 = arith.constant 0 : i32
    %c0_i32_0 = arith.constant 0 : i32
    return %c0_i32, %arg1 : i32, i32
  }
  func.func @transform_3(%arg0: i32, %arg1: i32, %arg2: i32) -> (i32, i32) {
    %c0_i32 = arith.constant 0 : i32
    return %arg0, %arg1 : i32, i32
  }
}

module attributes {stable_mosaic.version = 11 : i64} {
  func.func @_attention_kernel(%arg0: i32, %arg1: memref<1x8x96xbf16, #tpu.memory_space<vmem>>, %arg2: memref<1x1x8xf32, #tpu.memory_space<vmem>>, %arg3: memref<1x8x32xbf16, #tpu.memory_space<vmem>>) attributes {dimension_semantics = [#tpu.dimension_semantics<parallel>], iteration_bounds = array<i64: 2>, scalar_prefetch = 0 : i64, scratch_operands = 0 : i64, tpu.core_type = #tpu.core_type<tc>, window_params = [{transform_indices = @transform_0, window_bounds = array<i64: 1, 8, 96>}, {transform_indices = @transform_1, window_bounds = array<i64: 1, 1, 8>}, {transform_indices = @transform_2, window_bounds = array<i64: 1, 8, 32>}]} {
    %c0 = arith.constant 0 : index
    %c0_0 = arith.constant 0 : index
    %c0_1 = arith.constant 0 : index
    %0 = vector.load %arg1[%c0, %c0_0, %c0_1] : memref<1x8x96xbf16, #tpu.memory_space<vmem>>, vector<1x8x96xbf16>
    %1 = vector.shape_cast %0 : vector<1x8x96xbf16> to vector<8x96xbf16>
    %c0_2 = arith.constant 0 : index
    %c0_3 = arith.constant 0 : index
    %c0_4 = arith.constant 0 : index
    %2 = vector.load %arg2[%c0_2, %c0_3, %c0_4] : memref<1x1x8xf32, #tpu.memory_space<vmem>>, vector<1x1x8xf32>
    %3 = vector.shape_cast %2 : vector<1x1x8xf32> to vector<1x8xf32>
    %4 = tpu.iota {dimensions = array<i32: 0>} : vector<8x8xi32>
    %5 = tpu.iota {dimensions = array<i32: 1>} : vector<8x8xi32>
    %6 = arith.cmpi sge, %4, %5 : vector<8x8xi32>
    %cst = arith.constant 0.000000e+00 : f32
    %cst_5 = arith.constant -1.000000e+30 : f32
    %7 = vector.broadcast %cst : f32 to vector<8x8xf32>
    %8 = vector.broadcast %cst_5 : f32 to vector<8x8xf32>
    %9 = arith.select %6, %7, %8 : vector<8x8xi1>, vector<8x8xf32>
    %10 = vector.broadcast %3 : vector<1x8xf32> to vector<8x8xf32>
    %11 = arith.addf %9, %10 : vector<8x8xf32>
    %12 = vector.extract_strided_slice %1 {offsets = [0, 0], sizes = [8, 8], strides = [1, 1]} : vector<8x96xbf16> to vector<8x8xbf16>
    %13 = vector.extract_strided_slice %1 {offsets = [0, 32], sizes = [8, 8], strides = [1, 1]} : vector<8x96xbf16> to vector<8x8xbf16>
    %14 = vector.extract_strided_slice %1 {offsets = [0, 64], sizes = [8, 8], strides = [1, 1]} : vector<8x96xbf16> to vector<8x8xbf16>
    %cst_6 = arith.constant dense<0.000000e+00> : vector<8x8xf32>
    %15 = tpu.matmul %12, %13, %cst_6 {dimension_numbers = #tpu.dot_dimension_numbers<[1], [1], [0], [0], [0, 0, 1, 0], [], []>} : vector<8x8xbf16>, vector<8x8xbf16>, vector<8x8xf32> -> vector<8x8xf32>
    %cst_7 = arith.constant 0.353553385 : f32
    %16 = vector.broadcast %cst_7 : f32 to vector<8x8xf32>
    %17 = arith.mulf %15, %16 : vector<8x8xf32>
    %18 = arith.addf %17, %11 : vector<8x8xf32>
    %cst_8 = arith.constant dense<0xFF800000> : vector<8xf32>
    %19 = vector.multi_reduction <maximumf>, %18, %cst_8 [1] : vector<8x8xf32> to vector<8xf32>
    %20 = vector.shape_cast %19 : vector<8xf32> to vector<8x1xf32>
    %21 = vector.broadcast %20 : vector<8x1xf32> to vector<8x8xf32>
    %22 = arith.subf %18, %21 : vector<8x8xf32>
    %23 = math.exp %22 : vector<8x8xf32>
    %cst_9 = arith.constant dense<0.000000e+00> : vector<8xf32>
    %24 = vector.multi_reduction <add>, %23, %cst_9 [1] : vector<8x8xf32> to vector<8xf32>
    %25 = vector.shape_cast %24 : vector<8xf32> to vector<8x1xf32>
    %26 = tpu.reciprocal %25 {approx = true} : vector<8x1xf32> -> vector<8x1xf32>
    %27 = vector.broadcast %26 : vector<8x1xf32> to vector<8x8xf32>
    %28 = arith.mulf %23, %27 : vector<8x8xf32>
    %29 = arith.truncf %28 : vector<8x8xf32> to vector<8x8xbf16>
    %cst_10 = arith.constant dense<0.000000e+00> : vector<8x8xf32>
    %30 = tpu.matmul %29, %14, %cst_10 {dimension_numbers = #tpu.dot_dimension_numbers<[1], [0], [0], [1], [0, 0, 1, 1], [], []>} : vector<8x8xbf16>, vector<8x8xbf16>, vector<8x8xf32> -> vector<8x8xf32>
    %31 = vector.extract_strided_slice %1 {offsets = [0, 8], sizes = [8, 8], strides = [1, 1]} : vector<8x96xbf16> to vector<8x8xbf16>
    %32 = vector.extract_strided_slice %1 {offsets = [0, 40], sizes = [8, 8], strides = [1, 1]} : vector<8x96xbf16> to vector<8x8xbf16>
    %33 = vector.extract_strided_slice %1 {offsets = [0, 72], sizes = [8, 8], strides = [1, 1]} : vector<8x96xbf16> to vector<8x8xbf16>
    %cst_11 = arith.constant dense<0.000000e+00> : vector<8x8xf32>
    %34 = tpu.matmul %31, %32, %cst_11 {dimension_numbers = #tpu.dot_dimension_numbers<[1], [1], [0], [0], [0, 0, 1, 0], [], []>} : vector<8x8xbf16>, vector<8x8xbf16>, vector<8x8xf32> -> vector<8x8xf32>
    %cst_12 = arith.constant 0.353553385 : f32
    %35 = vector.broadcast %cst_12 : f32 to vector<8x8xf32>
    %36 = arith.mulf %34, %35 : vector<8x8xf32>
    %37 = arith.addf %36, %11 : vector<8x8xf32>
    %cst_13 = arith.constant dense<0xFF800000> : vector<8xf32>
    %38 = vector.multi_reduction <maximumf>, %37, %cst_13 [1] : vector<8x8xf32> to vector<8xf32>
    %39 = vector.shape_cast %38 : vector<8xf32> to vector<8x1xf32>
    %40 = vector.broadcast %39 : vector<8x1xf32> to vector<8x8xf32>
    %41 = arith.subf %37, %40 : vector<8x8xf32>
    %42 = math.exp %41 : vector<8x8xf32>
    %cst_14 = arith.constant dense<0.000000e+00> : vector<8xf32>
    %43 = vector.multi_reduction <add>, %42, %cst_14 [1] : vector<8x8xf32> to vector<8xf32>
    %44 = vector.shape_cast %43 : vector<8xf32> to vector<8x1xf32>
    %45 = tpu.reciprocal %44 {approx = true} : vector<8x1xf32> -> vector<8x1xf32>
    %46 = vector.broadcast %45 : vector<8x1xf32> to vector<8x8xf32>
    %47 = arith.mulf %42, %46 : vector<8x8xf32>
    %48 = arith.truncf %47 : vector<8x8xf32> to vector<8x8xbf16>
    %cst_15 = arith.constant dense<0.000000e+00> : vector<8x8xf32>
    %49 = tpu.matmul %48, %33, %cst_15 {dimension_numbers = #tpu.dot_dimension_numbers<[1], [0], [0], [1], [0, 0, 1, 1], [], []>} : vector<8x8xbf16>, vector<8x8xbf16>, vector<8x8xf32> -> vector<8x8xf32>
    %50 = vector.extract_strided_slice %1 {offsets = [0, 16], sizes = [8, 8], strides = [1, 1]} : vector<8x96xbf16> to vector<8x8xbf16>
    %51 = vector.extract_strided_slice %1 {offsets = [0, 48], sizes = [8, 8], strides = [1, 1]} : vector<8x96xbf16> to vector<8x8xbf16>
    %52 = vector.extract_strided_slice %1 {offsets = [0, 80], sizes = [8, 8], strides = [1, 1]} : vector<8x96xbf16> to vector<8x8xbf16>
    %cst_16 = arith.constant dense<0.000000e+00> : vector<8x8xf32>
    %53 = tpu.matmul %50, %51, %cst_16 {dimension_numbers = #tpu.dot_dimension_numbers<[1], [1], [0], [0], [0, 0, 1, 0], [], []>} : vector<8x8xbf16>, vector<8x8xbf16>, vector<8x8xf32> -> vector<8x8xf32>
    %cst_17 = arith.constant 0.353553385 : f32
    %54 = vector.broadcast %cst_17 : f32 to vector<8x8xf32>
    %55 = arith.mulf %53, %54 : vector<8x8xf32>
    %56 = arith.addf %55, %11 : vector<8x8xf32>
    %cst_18 = arith.constant dense<0xFF800000> : vector<8xf32>
    %57 = vector.multi_reduction <maximumf>, %56, %cst_18 [1] : vector<8x8xf32> to vector<8xf32>
    %58 = vector.shape_cast %57 : vector<8xf32> to vector<8x1xf32>
    %59 = vector.broadcast %58 : vector<8x1xf32> to vector<8x8xf32>
    %60 = arith.subf %56, %59 : vector<8x8xf32>
    %61 = math.exp %60 : vector<8x8xf32>
    %cst_19 = arith.constant dense<0.000000e+00> : vector<8xf32>
    %62 = vector.multi_reduction <add>, %61, %cst_19 [1] : vector<8x8xf32> to vector<8xf32>
    %63 = vector.shape_cast %62 : vector<8xf32> to vector<8x1xf32>
    %64 = tpu.reciprocal %63 {approx = true} : vector<8x1xf32> -> vector<8x1xf32>
    %65 = vector.broadcast %64 : vector<8x1xf32> to vector<8x8xf32>
    %66 = arith.mulf %61, %65 : vector<8x8xf32>
    %67 = arith.truncf %66 : vector<8x8xf32> to vector<8x8xbf16>
    %cst_20 = arith.constant dense<0.000000e+00> : vector<8x8xf32>
    %68 = tpu.matmul %67, %52, %cst_20 {dimension_numbers = #tpu.dot_dimension_numbers<[1], [0], [0], [1], [0, 0, 1, 1], [], []>} : vector<8x8xbf16>, vector<8x8xbf16>, vector<8x8xf32> -> vector<8x8xf32>
    %69 = vector.extract_strided_slice %1 {offsets = [0, 24], sizes = [8, 8], strides = [1, 1]} : vector<8x96xbf16> to vector<8x8xbf16>
    %70 = vector.extract_strided_slice %1 {offsets = [0, 56], sizes = [8, 8], strides = [1, 1]} : vector<8x96xbf16> to vector<8x8xbf16>
    %71 = vector.extract_strided_slice %1 {offsets = [0, 88], sizes = [8, 8], strides = [1, 1]} : vector<8x96xbf16> to vector<8x8xbf16>
    %cst_21 = arith.constant dense<0.000000e+00> : vector<8x8xf32>
    %72 = tpu.matmul %69, %70, %cst_21 {dimension_numbers = #tpu.dot_dimension_numbers<[1], [1], [0], [0], [0, 0, 1, 0], [], []>} : vector<8x8xbf16>, vector<8x8xbf16>, vector<8x8xf32> -> vector<8x8xf32>
    %cst_22 = arith.constant 0.353553385 : f32
    %73 = vector.broadcast %cst_22 : f32 to vector<8x8xf32>
    %74 = arith.mulf %72, %73 : vector<8x8xf32>
    %75 = arith.addf %74, %11 : vector<8x8xf32>
    %cst_23 = arith.constant dense<0xFF800000> : vector<8xf32>
    %76 = vector.multi_reduction <maximumf>, %75, %cst_23 [1] : vector<8x8xf32> to vector<8xf32>
    %77 = vector.shape_cast %76 : vector<8xf32> to vector<8x1xf32>
    %78 = vector.broadcast %77 : vector<8x1xf32> to vector<8x8xf32>
    %79 = arith.subf %75, %78 : vector<8x8xf32>
    %80 = math.exp %79 : vector<8x8xf32>
    %cst_24 = arith.constant dense<0.000000e+00> : vector<8xf32>
    %81 = vector.multi_reduction <add>, %80, %cst_24 [1] : vector<8x8xf32> to vector<8xf32>
    %82 = vector.shape_cast %81 : vector<8xf32> to vector<8x1xf32>
    %83 = tpu.reciprocal %82 {approx = true} : vector<8x1xf32> -> vector<8x1xf32>
    %84 = vector.broadcast %83 : vector<8x1xf32> to vector<8x8xf32>
    %85 = arith.mulf %80, %84 : vector<8x8xf32>
    %86 = arith.truncf %85 : vector<8x8xf32> to vector<8x8xbf16>
    %cst_25 = arith.constant dense<0.000000e+00> : vector<8x8xf32>
    %87 = tpu.matmul %86, %71, %cst_25 {dimension_numbers = #tpu.dot_dimension_numbers<[1], [0], [0], [1], [0, 0, 1, 1], [], []>} : vector<8x8xbf16>, vector<8x8xbf16>, vector<8x8xf32> -> vector<8x8xf32>
    %88 = tpu.concatenate %30, %49, %68, %87 in 1 : vector<8x8xf32>, vector<8x8xf32>, vector<8x8xf32>, vector<8x8xf32> -> vector<8x32xf32>
    %89 = arith.truncf %88 : vector<8x32xf32> to vector<8x32xbf16>
    %c0_26 = arith.constant 0 : index
    %c0_27 = arith.constant 0 : index
    %c0_28 = arith.constant 0 : index
    %90 = vector.load %arg3[%c0_26, %c0_27, %c0_28] : memref<1x8x32xbf16, #tpu.memory_space<vmem>>, vector<1x8x32xbf16>
    %91 = vector.shape_cast %90 : vector<1x8x32xbf16> to vector<8x32xbf16>
    %92 = vector.shape_cast %89 : vector<8x32xbf16> to vector<1x8x32xbf16>
    tpu.vector_store %arg3[%c0_26, %c0_27, %c0_28], %92 {strides = array<i32>} : memref<1x8x32xbf16, #tpu.memory_space<vmem>>, vector<1x8x32xbf16>,
    return
  }
  func.func @transform_0(%arg0: i32) -> (i32, i32, i32) {
    %c0_i32 = arith.constant 0 : i32
    %c0_i32_0 = arith.constant 0 : i32
    %c0_i32_1 = arith.constant 0 : i32
    return %arg0, %c0_i32, %c0_i32_0 : i32, i32, i32
  }
  func.func @transform_1(%arg0: i32) -> (i32, i32, i32) {
    %c0_i32 = arith.constant 0 : i32
    %c0_i32_0 = arith.constant 0 : i32
    %c0_i32_1 = arith.constant 0 : i32
    return %arg0, %c0_i32, %c0_i32_0 : i32, i32, i32
  }
  func.func @transform_2(%arg0: i32) -> (i32, i32, i32) {
    %c0_i32 = arith.constant 0 : i32
    %c0_i32_0 = arith.constant 0 : i32
    %c0_i32_1 = arith.constant 0 : i32
    return %arg0, %c0_i32, %c0_i32_0 : i32, i32, i32
  }
}

module attributes {stable_mosaic.version = 11 : i64} {
  func.func @_matmul_bias_kernel(%arg0: i32, %arg1: i32, %arg2: i32, %arg3: memref<16x32xbf16, #tpu.memory_space<vmem>>, %arg4: memref<32x32xbf16, #tpu.memory_space<vmem>>, %arg5: memref<1x32xf32, #tpu.memory_space<vmem>>, %arg6: memref<16x32xbf16, #tpu.memory_space<vmem>>, %arg7: memref<16x32xf32, #tpu.memory_space<vmem>>) attributes {dimension_semantics = [#tpu.dimension_semantics<parallel>, #tpu.dimension_semantics<parallel>, #tpu.dimension_semantics<arbitrary>], iteration_bounds = array<i64: 1, 1, 1>, scalar_prefetch = 0 : i64, scratch_operands = 1 : i64, tpu.core_type = #tpu.core_type<tc>, window_params = [{transform_indices = @transform_0, window_bounds = array<i64: 16, 32>}, {transform_indices = @transform_1, window_bounds = array<i64: 32, 32>}, {transform_indices = @transform_2, window_bounds = array<i64: 1, 32>}, {transform_indices = @transform_3, window_bounds = array<i64: 16, 32>}]} {
    %c0_i32 = arith.constant 0 : i32
    %0 = arith.cmpi eq, %arg2, %c0_i32 : i32
    %1 = arith.extui %0 : i1 to i32
    %c0_i32_0 = arith.constant 0 : i32
    %2 = arith.cmpi ne, %1, %c0_i32_0 : i32
    scf.if %2 {
      %cst_10 = arith.constant 0.000000e+00 : f32
      %12 = vector.broadcast %cst_10 : f32 to vector<16x32xf32>
      %c0_11 = arith.constant 0 : index
      %c0_12 = arith.constant 0 : index
      %13 = vector.load %arg7[%c0_11, %c0_12] : memref<16x32xf32, #tpu.memory_space<vmem>>, vector<16x32xf32>
      tpu.vector_store %arg7[%c0_11, %c0_12], %12 {strides = array<i32>} : memref<16x32xf32, #tpu.memory_space<vmem>>, vector<16x32xf32>,
    } else {
    }
    %c0 = arith.constant 0 : index
    %c0_1 = arith.constant 0 : index
    %3 = vector.load %arg7[%c0, %c0_1] : memref<16x32xf32, #tpu.memory_space<vmem>>, vector<16x32xf32>
    %c0_2 = arith.constant 0 : index
    %c0_3 = arith.constant 0 : index
    %4 = vector.load %arg3[%c0_2, %c0_3] : memref<16x32xbf16, #tpu.memory_space<vmem>>, vector<16x32xbf16>
    %c0_4 = arith.constant 0 : index
    %c0_5 = arith.constant 0 : index
    %5 = vector.load %arg4[%c0_4, %c0_5] : memref<32x32xbf16, #tpu.memory_space<vmem>>, vector<32x32xbf16>
    %cst = arith.constant dense<0.000000e+00> : vector<16x32xf32>
    %6 = tpu.matmul %4, %5, %cst {dimension_numbers = #tpu.dot_dimension_numbers<[1], [0], [0], [1], [0, 0, 1, 1], [], []>} : vector<16x32xbf16>, vector<32x32xbf16>, vector<16x32xf32> -> vector<16x32xf32>
    %7 = arith.addf %3, %6 : vector<16x32xf32>
    %c0_6 = arith.constant 0 : index
    %c0_7 = arith.constant 0 : index
    %8 = vector.load %arg7[%c0_6, %c0_7] : memref<16x32xf32, #tpu.memory_space<vmem>>, vector<16x32xf32>
    tpu.vector_store %arg7[%c0_6, %c0_7], %7 {strides = array<i32>} : memref<16x32xf32, #tpu.memory_space<vmem>>, vector<16x32xf32>,
    %c0_i32_8 = arith.constant 0 : i32
    %9 = arith.cmpi eq, %arg2, %c0_i32_8 : i32
    %10 = arith.extui %9 : i1 to i32
    %c0_i32_9 = arith.constant 0 : i32
    %11 = arith.cmpi ne, %10, %c0_i32_9 : i32
    scf.if %11 {
      %c0_10 = arith.constant 0 : index
      %c0_11 = arith.constant 0 : index
      %12 = vector.load %arg7[%c0_10, %c0_11] : memref<16x32xf32, #tpu.memory_space<vmem>>, vector<16x32xf32>
      %c0_12 = arith.constant 0 : index
      %c0_13 = arith.constant 0 : index
      %13 = vector.load %arg5[%c0_12, %c0_13] : memref<1x32xf32, #tpu.memory_space<vmem>>, vector<1x32xf32>
      %14 = vector.broadcast %13 : vector<1x32xf32> to vector<16x32xf32>
      %15 = arith.addf %12, %14 : vector<16x32xf32>
      %16 = arith.truncf %15 : vector<16x32xf32> to vector<16x32xbf16>
      %c0_14 = arith.constant 0 : index
      %c0_15 = arith.constant 0 : index
      %17 = vector.load %arg6[%c0_14, %c0_15] : memref<16x32xbf16, #tpu.memory_space<vmem>>, vector<16x32xbf16>
      tpu.vector_store %arg6[%c0_14, %c0_15], %16 {strides = array<i32>} : memref<16x32xbf16, #tpu.memory_space<vmem>>, vector<16x32xbf16>,
    } else {
    }
    return
  }
  func.func @transform_0(%arg0: i32, %arg1: i32, %arg2: i32) -> (i32, i32) {
    %c0_i32 = arith.constant 0 : i32
    return %arg0, %arg2 : i32, i32
  }
  func.func @transform_1(%arg0: i32, %arg1: i32, %arg2: i32) -> (i32, i32) {
    %c0_i32 = arith.constant 0 : i32
    return %arg2, %arg1 : i32, i32
  }
  func.func @transform_2(%arg0: i32, %arg1: i32, %arg2: i32) -> (i32, i32) {
    %c0_i32 = arith.constant 0 : i32
    %c0_i32_0 = arith.constant 0 : i32
    return %c0_i32, %arg1 : i32, i32
  }
  func.func @transform_3(%arg0: i32, %arg1: i32, %arg2: i32) -> (i32, i32) {
    %c0_i32 = arith.constant 0 : i32
    return %arg0, %arg1 : i32, i32
  }
}

module attributes {stable_mosaic.version = 11 : i64} {
  func.func @_layernorm_kernel(%arg0: i32, %arg1: memref<16x32xbf16, #tpu.memory_space<vmem>>, %arg2: memref<16x32xbf16, #tpu.memory_space<vmem>>, %arg3: memref<1x32xf32, #tpu.memory_space<vmem>>, %arg4: memref<1x32xf32, #tpu.memory_space<vmem>>, %arg5: memref<16x32xbf16, #tpu.memory_space<vmem>>) attributes {dimension_semantics = [#tpu.dimension_semantics<parallel>], iteration_bounds = array<i64: 1>, scalar_prefetch = 0 : i64, scratch_operands = 0 : i64, tpu.core_type = #tpu.core_type<tc>, window_params = [{transform_indices = @transform_0, window_bounds = array<i64: 16, 32>}, {transform_indices = @transform_1, window_bounds = array<i64: 16, 32>}, {pipeline_mode = #tpu.pipeline_mode<synchronous>, transform_indices = @transform_2, window_bounds = array<i64: 1, 32>}, {pipeline_mode = #tpu.pipeline_mode<synchronous>, transform_indices = @transform_3, window_bounds = array<i64: 1, 32>}, {transform_indices = @transform_4, window_bounds = array<i64: 16, 32>}]} {
    %c0 = arith.constant 0 : index
    %c0_0 = arith.constant 0 : index
    %0 = vector.load %arg1[%c0, %c0_0] : memref<16x32xbf16, #tpu.memory_space<vmem>>, vector<16x32xbf16>
    %1 = arith.extf %0 : vector<16x32xbf16> to vector<16x32xf32>
    %c0_1 = arith.constant 0 : index
    %c0_2 = arith.constant 0 : index
    %2 = vector.load %arg2[%c0_1, %c0_2] : memref<16x32xbf16, #tpu.memory_space<vmem>>, vector<16x32xbf16>
    %3 = arith.extf %2 : vector<16x32xbf16> to vector<16x32xf32>
    %4 = arith.addf %1, %3 : vector<16x32xf32>
    %cst = arith.constant dense<0.000000e+00> : vector<16xf32>
    %5 = vector.multi_reduction <add>, %4, %cst [1] : vector<16x32xf32> to vector<16xf32>
    %6 = vector.shape_cast %5 : vector<16xf32> to vector<16x1xf32>
    %cst_3 = arith.constant 3.200000e+01 : f32
    %7 = vector.broadcast %cst_3 : f32 to vector<16x1xf32>
    %8 = arith.divf %6, %7 : vector<16x1xf32>
    %9 = vector.broadcast %8 : vector<16x1xf32> to vector<16x32xf32>
    %10 = arith.subf %4, %9 : vector<16x32xf32>
    %11 = arith.mulf %10, %10 : vector<16x32xf32>
    %cst_4 = arith.constant dense<0.000000e+00> : vector<16xf32>
    %12 = vector.multi_reduction <add>, %11, %cst_4 [1] : vector<16x32xf32> to vector<16xf32>
    %13 = vector.shape_cast %12 : vector<16xf32> to vector<16x1xf32>
    %cst_5 = arith.constant 3.200000e+01 : f32
    %14 = vector.broadcast %cst_5 : f32 to vector<16x1xf32>
    %15 = arith.divf %13, %14 : vector<16x1xf32>
    %16 = vector.broadcast %8 : vector<16x1xf32> to vector<16x32xf32>
    %17 = arith.subf %4, %16 : vector<16x32xf32>
    %cst_6 = arith.constant 9.99999974E-6 : f32
    %18 = vector.broadcast %cst_6 : f32 to vector<16x1xf32>
    %19 = arith.addf %15, %18 : vector<16x1xf32>
    %20 = math.rsqrt %19 : vector<16x1xf32>
    %21 = vector.broadcast %20 : vector<16x1xf32> to vector<16x32xf32>
    %22 = arith.mulf %17, %21 : vector<16x32xf32>
    %c0_7 = arith.constant 0 : index
    %c0_8 = arith.constant 0 : index
    %23 = vector.load %arg3[%c0_7, %c0_8] : memref<1x32xf32, #tpu.memory_space<vmem>>, vector<1x32xf32>
    %24 = vector.broadcast %23 : vector<1x32xf32> to vector<16x32xf32>
    %25 = arith.mulf %22, %24 : vector<16x32xf32>
    %c0_9 = arith.constant 0 : index
    %c0_10 = arith.constant 0 : index
    %26 = vector.load %arg4[%c0_9, %c0_10] : memref<1x32xf32, #tpu.memory_space<vmem>>, vector<1x32xf32>
    %27 = vector.broadcast %26 : vector<1x32xf32> to vector<16x32xf32>
    %28 = arith.addf %25, %27 : vector<16x32xf32>
    %29 = arith.truncf %28 : vector<16x32xf32> to vector<16x32xbf16>
    %c0_11 = arith.constant 0 : index
    %c0_12 = arith.constant 0 : index
    %30 = vector.load %arg5[%c0_11, %c0_12] : memref<16x32xbf16, #tpu.memory_space<vmem>>, vector<16x32xbf16>
    tpu.vector_store %arg5[%c0_11, %c0_12], %29 {strides = array<i32>} : memref<16x32xbf16, #tpu.memory_space<vmem>>, vector<16x32xbf16>,
    return
  }
  func.func @transform_0(%arg0: i32) -> (i32, i32) {
    %c0_i32 = arith.constant 0 : i32
    %c0_i32_0 = arith.constant 0 : i32
    return %arg0, %c0_i32 : i32, i32
  }
  func.func @transform_1(%arg0: i32) -> (i32, i32) {
    %c0_i32 = arith.constant 0 : i32
    %c0_i32_0 = arith.constant 0 : i32
    return %arg0, %c0_i32 : i32, i32
  }
  func.func @transform_2(%arg0: i32) -> (i32, i32) {
    %c0_i32 = arith.constant 0 : i32
    %c0_i32_0 = arith.constant 0 : i32
    %c0_i32_1 = arith.constant 0 : i32
    return %c0_i32, %c0_i32_0 : i32, i32
  }
  func.func @transform_3(%arg0: i32) -> (i32, i32) {
    %c0_i32 = arith.constant 0 : i32
    %c0_i32_0 = arith.constant 0 : i32
    %c0_i32_1 = arith.constant 0 : i32
    return %c0_i32, %c0_i32_0 : i32, i32
  }
  func.func @transform_4(%arg0: i32) -> (i32, i32) {
    %c0_i32 = arith.constant 0 : i32
    %c0_i32_0 = arith.constant 0 : i32
    return %arg0, %c0_i32 : i32, i32
  }
}

module attributes {stable_mosaic.version = 11 : i64} {
  func.func @_matmul_bias_kernel(%arg0: i32, %arg1: i32, %arg2: i32, %arg3: memref<16x32xbf16, #tpu.memory_space<vmem>>, %arg4: memref<32x64xbf16, #tpu.memory_space<vmem>>, %arg5: memref<1x64xf32, #tpu.memory_space<vmem>>, %arg6: memref<16x64xbf16, #tpu.memory_space<vmem>>, %arg7: memref<16x64xf32, #tpu.memory_space<vmem>>) attributes {dimension_semantics = [#tpu.dimension_semantics<parallel>, #tpu.dimension_semantics<parallel>, #tpu.dimension_semantics<arbitrary>], iteration_bounds = array<i64: 1, 1, 1>, scalar_prefetch = 0 : i64, scratch_operands = 1 : i64, tpu.core_type = #tpu.core_type<tc>, window_params = [{transform_indices = @transform_0, window_bounds = array<i64: 16, 32>}, {transform_indices = @transform_1, window_bounds = array<i64: 32, 64>}, {transform_indices = @transform_2, window_bounds = array<i64: 1, 64>}, {transform_indices = @transform_3, window_bounds = array<i64: 16, 64>}]} {
    %c0_i32 = arith.constant 0 : i32
    %0 = arith.cmpi eq, %arg2, %c0_i32 : i32
    %1 = arith.extui %0 : i1 to i32
    %c0_i32_0 = arith.constant 0 : i32
    %2 = arith.cmpi ne, %1, %c0_i32_0 : i32
    scf.if %2 {
      %cst_10 = arith.constant 0.000000e+00 : f32
      %12 = vector.broadcast %cst_10 : f32 to vector<16x64xf32>
      %c0_11 = arith.constant 0 : index
      %c0_12 = arith.constant 0 : index
      %13 = vector.load %arg7[%c0_11, %c0_12] : memref<16x64xf32, #tpu.memory_space<vmem>>, vector<16x64xf32>
      tpu.vector_store %arg7[%c0_11, %c0_12], %12 {strides = array<i32>} : memref<16x64xf32, #tpu.memory_space<vmem>>, vector<16x64xf32>,
    } else {
    }
    %c0 = arith.constant 0 : index
    %c0_1 = arith.constant 0 : index
    %3 = vector.load %arg7[%c0, %c0_1] : memref<16x64xf32, #tpu.memory_space<vmem>>, vector<16x64xf32>
    %c0_2 = arith.constant 0 : index
    %c0_3 = arith.constant 0 : index
    %4 = vector.load %arg3[%c0_2, %c0_3] : memref<16x32xbf16, #tpu.memory_space<vmem>>, vector<16x32xbf16>
    %c0_4 = arith.constant 0 : index
    %c0_5 = arith.constant 0 : index
    %5 = vector.load %arg4[%c0_4, %c0_5] : memref<32x64xbf16, #tpu.memory_space<vmem>>, vector<32x64xbf16>
    %cst = arith.constant dense<0.000000e+00> : vector<16x64xf32>
    %6 = tpu.matmul %4, %5, %cst {dimension_numbers = #tpu.dot_dimension_numbers<[1], [0], [0], [1], [0, 0, 1, 1], [], []>} : vector<16x32xbf16>, vector<32x64xbf16>, vector<16x64xf32> -> vector<16x64xf32>
    %7 = arith.addf %3, %6 : vector<16x64xf32>
    %c0_6 = arith.constant 0 : index
    %c0_7 = arith.constant 0 : index
    %8 = vector.load %arg7[%c0_6, %c0_7] : memref<16x64xf32, #tpu.memory_space<vmem>>, vector<16x64xf32>
    tpu.vector_store %arg7[%c0_6, %c0_7], %7 {strides = array<i32>} : memref<16x64xf32, #tpu.memory_space<vmem>>, vector<16x64xf32>,
    %c0_i32_8 = arith.constant 0 : i32
    %9 = arith.cmpi eq, %arg2, %c0_i32_8 : i32
    %10 = arith.extui %9 : i1 to i32
    %c0_i32_9 = arith.constant 0 : i32
    %11 = arith.cmpi ne, %10, %c0_i32_9 : i32
    scf.if %11 {
      %c0_10 = arith.constant 0 : index
      %c0_11 = arith.constant 0 : index
      %12 = vector.load %arg7[%c0_10, %c0_11] : memref<16x64xf32, #tpu.memory_space<vmem>>, vector<16x64xf32>
      %c0_12 = arith.constant 0 : index
      %c0_13 = arith.constant 0 : index
      %13 = vector.load %arg5[%c0_12, %c0_13] : memref<1x64xf32, #tpu.memory_space<vmem>>, vector<1x64xf32>
      %14 = vector.broadcast %13 : vector<1x64xf32> to vector<16x64xf32>
      %15 = arith.addf %12, %14 : vector<16x64xf32>
      %cst_14 = arith.constant 0.000000e+00 : f32
      %16 = vector.broadcast %cst_14 : f32 to vector<16x64xf32>
      %17 = arith.maximumf %15, %16 : vector<16x64xf32>
      %18 = arith.truncf %17 : vector<16x64xf32> to vector<16x64xbf16>
      %c0_15 = arith.constant 0 : index
      %c0_16 = arith.constant 0 : index
      %19 = vector.load %arg6[%c0_15, %c0_16] : memref<16x64xbf16, #tpu.memory_space<vmem>>, vector<16x64xbf16>
      tpu.vector_store %arg6[%c0_15, %c0_16], %18 {strides = array<i32>} : memref<16x64xbf16, #tpu.memory_space<vmem>>, vector<16x64xbf16>,
    } else {
    }
    return
  }
  func.func @transform_0(%arg0: i32, %arg1: i32, %arg2: i32) -> (i32, i32) {
    %c0_i32 = arith.constant 0 : i32
    return %arg0, %arg2 : i32, i32
  }
  func.func @transform_1(%arg0: i32, %arg1: i32, %arg2: i32) -> (i32, i32) {
    %c0_i32 = arith.constant 0 : i32
    return %arg2, %arg1 : i32, i32
  }
  func.func @transform_2(%arg0: i32, %arg1: i32, %arg2: i32) -> (i32, i32) {
    %c0_i32 = arith.constant 0 : i32
    %c0_i32_0 = arith.constant 0 : i32
    return %c0_i32, %arg1 : i32, i32
  }
  func.func @transform_3(%arg0: i32, %arg1: i32, %arg2: i32) -> (i32, i32) {
    %c0_i32 = arith.constant 0 : i32
    return %arg0, %arg1 : i32, i32
  }
}

module attributes {stable_mosaic.version = 11 : i64} {
  func.func @_matmul_bias_kernel(%arg0: i32, %arg1: i32, %arg2: i32, %arg3: memref<16x64xbf16, #tpu.memory_space<vmem>>, %arg4: memref<64x32xbf16, #tpu.memory_space<vmem>>, %arg5: memref<1x32xf32, #tpu.memory_space<vmem>>, %arg6: memref<16x32xbf16, #tpu.memory_space<vmem>>, %arg7: memref<16x32xf32, #tpu.memory_space<vmem>>) attributes {dimension_semantics = [#tpu.dimension_semantics<parallel>, #tpu.dimension_semantics<parallel>, #tpu.dimension_semantics<arbitrary>], iteration_bounds = array<i64: 1, 1, 1>, scalar_prefetch = 0 : i64, scratch_operands = 1 : i64, tpu.core_type = #tpu.core_type<tc>, window_params = [{transform_indices = @transform_0, window_bounds = array<i64: 16, 64>}, {transform_indices = @transform_1, window_bounds = array<i64: 64, 32>}, {transform_indices = @transform_2, window_bounds = array<i64: 1, 32>}, {transform_indices = @transform_3, window_bounds = array<i64: 16, 32>}]} {
    %c0_i32 = arith.constant 0 : i32
    %0 = arith.cmpi eq, %arg2, %c0_i32 : i32
    %1 = arith.extui %0 : i1 to i32
    %c0_i32_0 = arith.constant 0 : i32
    %2 = arith.cmpi ne, %1, %c0_i32_0 : i32
    scf.if %2 {
      %cst_10 = arith.constant 0.000000e+00 : f32
      %12 = vector.broadcast %cst_10 : f32 to vector<16x32xf32>
      %c0_11 = arith.constant 0 : index
      %c0_12 = arith.constant 0 : index
      %13 = vector.load %arg7[%c0_11, %c0_12] : memref<16x32xf32, #tpu.memory_space<vmem>>, vector<16x32xf32>
      tpu.vector_store %arg7[%c0_11, %c0_12], %12 {strides = array<i32>} : memref<16x32xf32, #tpu.memory_space<vmem>>, vector<16x32xf32>,
    } else {
    }
    %c0 = arith.constant 0 : index
    %c0_1 = arith.constant 0 : index
    %3 = vector.load %arg7[%c0, %c0_1] : memref<16x32xf32, #tpu.memory_space<vmem>>, vector<16x32xf32>
    %c0_2 = arith.constant 0 : index
    %c0_3 = arith.constant 0 : index
    %4 = vector.load %arg3[%c0_2, %c0_3] : memref<16x64xbf16, #tpu.memory_space<vmem>>, vector<16x64xbf16>
    %c0_4 = arith.constant 0 : index
    %c0_5 = arith.constant 0 : index
    %5 = vector.load %arg4[%c0_4, %c0_5] : memref<64x32xbf16, #tpu.memory_space<vmem>>, vector<64x32xbf16>
    %cst = arith.constant dense<0.000000e+00> : vector<16x32xf32>
    %6 = tpu.matmul %4, %5, %cst {dimension_numbers = #tpu.dot_dimension_numbers<[1], [0], [0], [1], [0, 0, 1, 1], [], []>} : vector<16x64xbf16>, vector<64x32xbf16>, vector<16x32xf32> -> vector<16x32xf32>
    %7 = arith.addf %3, %6 : vector<16x32xf32>
    %c0_6 = arith.constant 0 : index
    %c0_7 = arith.constant 0 : index
    %8 = vector.load %arg7[%c0_6, %c0_7] : memref<16x32xf32, #tpu.memory_space<vmem>>, vector<16x32xf32>
    tpu.vector_store %arg7[%c0_6, %c0_7], %7 {strides = array<i32>} : memref<16x32xf32, #tpu.memory_space<vmem>>, vector<16x32xf32>,
    %c0_i32_8 = arith.constant 0 : i32
    %9 = arith.cmpi eq, %arg2, %c0_i32_8 : i32
    %10 = arith.extui %9 : i1 to i32
    %c0_i32_9 = arith.constant 0 : i32
    %11 = arith.cmpi ne, %10, %c0_i32_9 : i32
    scf.if %11 {
      %c0_10 = arith.constant 0 : index
      %c0_11 = arith.constant 0 : index
      %12 = vector.load %arg7[%c0_10, %c0_11] : memref<16x32xf32, #tpu.memory_space<vmem>>, vector<16x32xf32>
      %c0_12 = arith.constant 0 : index
      %c0_13 = arith.constant 0 : index
      %13 = vector.load %arg5[%c0_12, %c0_13] : memref<1x32xf32, #tpu.memory_space<vmem>>, vector<1x32xf32>
      %14 = vector.broadcast %13 : vector<1x32xf32> to vector<16x32xf32>
      %15 = arith.addf %12, %14 : vector<16x32xf32>
      %16 = arith.truncf %15 : vector<16x32xf32> to vector<16x32xbf16>
      %c0_14 = arith.constant 0 : index
      %c0_15 = arith.constant 0 : index
      %17 = vector.load %arg6[%c0_14, %c0_15] : memref<16x32xbf16, #tpu.memory_space<vmem>>, vector<16x32xbf16>
      tpu.vector_store %arg6[%c0_14, %c0_15], %16 {strides = array<i32>} : memref<16x32xbf16, #tpu.memory_space<vmem>>, vector<16x32xbf16>,
    } else {
    }
    return
  }
  func.func @transform_0(%arg0: i32, %arg1: i32, %arg2: i32) -> (i32, i32) {
    %c0_i32 = arith.constant 0 : i32
    return %arg0, %arg2 : i32, i32
  }
  func.func @transform_1(%arg0: i32, %arg1: i32, %arg2: i32) -> (i32, i32) {
    %c0_i32 = arith.constant 0 : i32
    return %arg2, %arg1 : i32, i32
  }
  func.func @transform_2(%arg0: i32, %arg1: i32, %arg2: i32) -> (i32, i32) {
    %c0_i32 = arith.constant 0 : i32
    %c0_i32_0 = arith.constant 0 : i32
    return %c0_i32, %arg1 : i32, i32
  }
  func.func @transform_3(%arg0: i32, %arg1: i32, %arg2: i32) -> (i32, i32) {
    %c0_i32 = arith.constant 0 : i32
    return %arg0, %arg1 : i32, i32
  }
}

module attributes {stable_mosaic.version = 11 : i64} {
  func.func @_layernorm_kernel(%arg0: i32, %arg1: memref<16x32xbf16, #tpu.memory_space<vmem>>, %arg2: memref<1x32xf32, #tpu.memory_space<vmem>>, %arg3: memref<1x32xf32, #tpu.memory_space<vmem>>, %arg4: memref<16x32xbf16, #tpu.memory_space<vmem>>) attributes {dimension_semantics = [#tpu.dimension_semantics<parallel>], iteration_bounds = array<i64: 1>, scalar_prefetch = 0 : i64, scratch_operands = 0 : i64, tpu.core_type = #tpu.core_type<tc>, window_params = [{transform_indices = @transform_0, window_bounds = array<i64: 16, 32>}, {pipeline_mode = #tpu.pipeline_mode<synchronous>, transform_indices = @transform_1, window_bounds = array<i64: 1, 32>}, {pipeline_mode = #tpu.pipeline_mode<synchronous>, transform_indices = @transform_2, window_bounds = array<i64: 1, 32>}, {transform_indices = @transform_3, window_bounds = array<i64: 16, 32>}]} {
    %c0 = arith.constant 0 : index
    %c0_0 = arith.constant 0 : index
    %0 = vector.load %arg1[%c0, %c0_0] : memref<16x32xbf16, #tpu.memory_space<vmem>>, vector<16x32xbf16>
    %1 = arith.extf %0 : vector<16x32xbf16> to vector<16x32xf32>
    %cst = arith.constant dense<0.000000e+00> : vector<16xf32>
    %2 = vector.multi_reduction <add>, %1, %cst [1] : vector<16x32xf32> to vector<16xf32>
    %3 = vector.shape_cast %2 : vector<16xf32> to vector<16x1xf32>
    %cst_1 = arith.constant 3.200000e+01 : f32
    %4 = vector.broadcast %cst_1 : f32 to vector<16x1xf32>
    %5 = arith.divf %3, %4 : vector<16x1xf32>
    %6 = vector.broadcast %5 : vector<16x1xf32> to vector<16x32xf32>
    %7 = arith.subf %1, %6 : vector<16x32xf32>
    %8 = arith.mulf %7, %7 : vector<16x32xf32>
    %cst_2 = arith.constant dense<0.000000e+00> : vector<16xf32>
    %9 = vector.multi_reduction <add>, %8, %cst_2 [1] : vector<16x32xf32> to vector<16xf32>
    %10 = vector.shape_cast %9 : vector<16xf32> to vector<16x1xf32>
    %cst_3 = arith.constant 3.200000e+01 : f32
    %11 = vector.broadcast %cst_3 : f32 to vector<16x1xf32>
    %12 = arith.divf %10, %11 : vector<16x1xf32>
    %13 = vector.broadcast %5 : vector<16x1xf32> to vector<16x32xf32>
    %14 = arith.subf %1, %13 : vector<16x32xf32>
    %cst_4 = arith.constant 9.99999974E-6 : f32
    %15 = vector.broadcast %cst_4 : f32 to vector<16x1xf32>
    %16 = arith.addf %12, %15 : vector<16x1xf32>
    %17 = math.rsqrt %16 : vector<16x1xf32>
    %18 = vector.broadcast %17 : vector<16x1xf32> to vector<16x32xf32>
    %19 = arith.mulf %14, %18 : vector<16x32xf32>
    %c0_5 = arith.constant 0 : index
    %c0_6 = arith.constant 0 : index
    %20 = vector.load %arg2[%c0_5, %c0_6] : memref<1x32xf32, #tpu.memory_space<vmem>>, vector<1x32xf32>
    %21 = vector.broadcast %20 : vector<1x32xf32> to vector<16x32xf32>
    %22 = arith.mulf %19, %21 : vector<16x32xf32>
    %c0_7 = arith.constant 0 : index
    %c0_8 = arith.constant 0 : index
    %23 = vector.load %arg3[%c0_7, %c0_8] : memref<1x32xf32, #tpu.memory_space<vmem>>, vector<1x32xf32>
    %24 = vector.broadcast %23 : vector<1x32xf32> to vector<16x32xf32>
    %25 = arith.addf %22, %24 : vector<16x32xf32>
    %26 = arith.truncf %25 : vector<16x32xf32> to vector<16x32xbf16>
    %c0_9 = arith.constant 0 : index
    %c0_10 = arith.constant 0 : index
    %27 = vector.load %arg4[%c0_9, %c0_10] : memref<16x32xbf16, #tpu.memory_space<vmem>>, vector<16x32xbf16>
    tpu.vector_store %arg4[%c0_9, %c0_10], %26 {strides = array<i32>} : memref<16x32xbf16, #tpu.memory_space<vmem>>, vector<16x32xbf16>,
    return
  }
  func.func @transform_0(%arg0: i32) -> (i32, i32) {
    %c0_i32 = arith.constant 0 : i32
    %c0_i32_0 = arith.constant 0 : i32
    return %arg0, %c0_i32 : i32, i32
  }
  func.func @transform_1(%arg0: i32) -> (i32, i32) {
    %c0_i32 = arith.constant 0 : i32
    %c0_i32_0 = arith.constant 0 : i32
    %c0_i32_1 = arith.constant 0 : i32
    return %c0_i32, %c0_i32_0 : i32, i32
  }
  func.func @transform_2(%arg0: i32) -> (i32, i32) {
    %c0_i32 = arith.constant 0 : i32
    %c0_i32_0 = arith.constant 0 : i32
    %c0_i32_1 = arith.constant 0 : i32
    return %c0_i32, %c0_i32_0 : i32, i32
  }
  func.func @transform_3(%arg0: i32) -> (i32, i32) {
    %c0_i32 = arith.constant 0 : i32
    %c0_i32_0 = arith.constant 0 : i32
    return %arg0, %c0_i32 : i32, i32
  }
}

module attributes {stable_mosaic.version = 11 : i64} {
  func.func @_matmul_bias_kernel(%arg0: i32, %arg1: i32, %arg2: i32, %arg3: memref<16x32xbf16, #tpu.memory_space<vmem>>, %arg4: memref<32x40xbf16, #tpu.memory_space<vmem>>, %arg5: memref<1x40xf32, #tpu.memory_space<vmem>>, %arg6: memref<16x40xf32, #tpu.memory_space<vmem>>, %arg7: memref<16x40xf32, #tpu.memory_space<vmem>>) attributes {dimension_semantics = [#tpu.dimension_semantics<parallel>, #tpu.dimension_semantics<parallel>, #tpu.dimension_semantics<arbitrary>], iteration_bounds = array<i64: 1, 1, 1>, scalar_prefetch = 0 : i64, scratch_operands = 1 : i64, tpu.core_type = #tpu.core_type<tc>, window_params = [{transform_indices = @transform_0, window_bounds = array<i64: 16, 32>}, {transform_indices = @transform_1, window_bounds = array<i64: 32, 40>}, {transform_indices = @transform_2, window_bounds = array<i64: 1, 40>}, {transform_indices = @transform_3, window_bounds = array<i64: 16, 40>}]} {
    %c0_i32 = arith.constant 0 : i32
    %0 = arith.cmpi eq, %arg2, %c0_i32 : i32
    %1 = arith.extui %0 : i1 to i32
    %c0_i32_0 = arith.constant 0 : i32
    %2 = arith.cmpi ne, %1, %c0_i32_0 : i32
    scf.if %2 {
      %cst_10 = arith.constant 0.000000e+00 : f32
      %12 = vector.broadcast %cst_10 : f32 to vector<16x40xf32>
      %c0_11 = arith.constant 0 : index
      %c0_12 = arith.constant 0 : index
      %13 = vector.load %arg7[%c0_11, %c0_12] : memref<16x40xf32, #tpu.memory_space<vmem>>, vector<16x40xf32>
      tpu.vector_store %arg7[%c0_11, %c0_12], %12 {strides = array<i32>} : memref<16x40xf32, #tpu.memory_space<vmem>>, vector<16x40xf32>,
    } else {
    }
    %c0 = arith.constant 0 : index
    %c0_1 = arith.constant 0 : index
    %3 = vector.load %arg7[%c0, %c0_1] : memref<16x40xf32, #tpu.memory_space<vmem>>, vector<16x40xf32>
    %c0_2 = arith.constant 0 : index
    %c0_3 = arith.constant 0 : index
    %4 = vector.load %arg3[%c0_2, %c0_3] : memref<16x32xbf16, #tpu.memory_space<vmem>>, vector<16x32xbf16>
    %c0_4 = arith.constant 0 : index
    %c0_5 = arith.constant 0 : index
    %5 = vector.load %arg4[%c0_4, %c0_5] : memref<32x40xbf16, #tpu.memory_space<vmem>>, vector<32x40xbf16>
    %cst = arith.constant dense<0.000000e+00> : vector<16x40xf32>
    %6 = tpu.matmul %4, %5, %cst {dimension_numbers = #tpu.dot_dimension_numbers<[1], [0], [0], [1], [0, 0, 1, 1], [], []>} : vector<16x32xbf16>, vector<32x40xbf16>, vector<16x40xf32> -> vector<16x40xf32>
    %7 = arith.addf %3, %6 : vector<16x40xf32>
    %c0_6 = arith.constant 0 : index
    %c0_7 = arith.constant 0 : index
    %8 = vector.load %arg7[%c0_6, %c0_7] : memref<16x40xf32, #tpu.memory_space<vmem>>, vector<16x40xf32>
    tpu.vector_store %arg7[%c0_6, %c0_7], %7 {strides = array<i32>} : memref<16x40xf32, #tpu.memory_space<vmem>>, vector<16x40xf32>,
    %c0_i32_8 = arith.constant 0 : i32
    %9 = arith.cmpi eq, %arg2, %c0_i32_8 : i32
    %10 = arith.extui %9 : i1 to i32
    %c0_i32_9 = arith.constant 0 : i32
    %11 = arith.cmpi ne, %10, %c0_i32_9 : i32
    scf.if %11 {
      %c0_10 = arith.constant 0 : index
      %c0_11 = arith.constant 0 : index
      %12 = vector.load %arg7[%c0_10, %c0_11] : memref<16x40xf32, #tpu.memory_space<vmem>>, vector<16x40xf32>
      %c0_12 = arith.constant 0 : index
      %c0_13 = arith.constant 0 : index
      %13 = vector.load %arg5[%c0_12, %c0_13] : memref<1x40xf32, #tpu.memory_space<vmem>>, vector<1x40xf32>
      %14 = vector.broadcast %13 : vector<1x40xf32> to vector<16x40xf32>
      %15 = arith.addf %12, %14 : vector<16x40xf32>
      %c0_14 = arith.constant 0 : index
      %c0_15 = arith.constant 0 : index
      %16 = vector.load %arg6[%c0_14, %c0_15] : memref<16x40xf32, #tpu.memory_space<vmem>>, vector<16x40xf32>
      tpu.vector_store %arg6[%c0_14, %c0_15], %15 {strides = array<i32>} : memref<16x40xf32, #tpu.memory_space<vmem>>, vector<16x40xf32>,
    } else {
    }
    return
  }
  func.func @transform_0(%arg0: i32, %arg1: i32, %arg2: i32) -> (i32, i32) {
    %c0_i32 = arith.constant 0 : i32
    return %arg0, %arg2 : i32, i32
  }
  func.func @transform_1(%arg0: i32, %arg1: i32, %arg2: i32) -> (i32, i32) {
    %c0_i32 = arith.constant 0 : i32
    return %arg2, %arg1 : i32, i32
  }
  func.func @transform_2(%arg0: i32, %arg1: i32, %arg2: i32) -> (i32, i32) {
    %c0_i32 = arith.constant 0 : i32
    %c0_i32_0 = arith.constant 0 : i32
    return %c0_i32, %arg1 : i32, i32
  }
  func.func @transform_3(%arg0: i32, %arg1: i32, %arg2: i32) -> (i32, i32) {
    %c0_i32 = arith.constant 0 : i32
    return %arg0, %arg1 : i32, i32
  }
}

module attributes {stable_mosaic.version = 11 : i64} {
  func.func @_ce_kernel(%arg0: i32, %arg1: memref<16x40xf32, #tpu.memory_space<vmem>>, %arg2: memref<16x1xi32, #tpu.memory_space<vmem>>, %arg3: memref<1x1xf32, #tpu.memory_space<vmem>>, %arg4: memref<1x1xf32, #tpu.memory_space<vmem>>) attributes {dimension_semantics = [#tpu.dimension_semantics<arbitrary>], iteration_bounds = array<i64: 1>, scalar_prefetch = 0 : i64, scratch_operands = 0 : i64, tpu.core_type = #tpu.core_type<tc>, window_params = [{transform_indices = @transform_0, window_bounds = array<i64: 16, 40>}, {transform_indices = @transform_1, window_bounds = array<i64: 16, 1>}, {pipeline_mode = #tpu.pipeline_mode<synchronous>, transform_indices = @transform_2, window_bounds = array<i64: 1, 1>}, {pipeline_mode = #tpu.pipeline_mode<synchronous>, transform_indices = @transform_3, window_bounds = array<i64: 1, 1>}]} {
    %c0_i32 = arith.constant 0 : i32
    %0 = arith.cmpi eq, %arg0, %c0_i32 : i32
    %1 = arith.extui %0 : i1 to i32
    %c0_i32_0 = arith.constant 0 : i32
    %2 = arith.cmpi ne, %1, %c0_i32_0 : i32
    scf.if %2 {
      %cst_18 = arith.constant 0.000000e+00 : f32
      %43 = vector.broadcast %cst_18 : f32 to vector<1x1xf32>
      %c0_19 = arith.constant 0 : index
      %c0_20 = arith.constant 0 : index
      %44 = vector.load %arg3[%c0_19, %c0_20] : memref<1x1xf32, #tpu.memory_space<vmem>>, vector<1x1xf32>
      tpu.vector_store %arg3[%c0_19, %c0_20], %43 {strides = array<i32>} : memref<1x1xf32, #tpu.memory_space<vmem>>, vector<1x1xf32>,
      %cst_21 = arith.constant 0.000000e+00 : f32
      %45 = vector.broadcast %cst_21 : f32 to vector<1x1xf32>
      %c0_22 = arith.constant 0 : index
      %c0_23 = arith.constant 0 : index
      %46 = vector.load %arg4[%c0_22, %c0_23] : memref<1x1xf32, #tpu.memory_space<vmem>>, vector<1x1xf32>
      tpu.vector_store %arg4[%c0_22, %c0_23], %45 {strides = array<i32>} : memref<1x1xf32, #tpu.memory_space<vmem>>, vector<1x1xf32>,
    } else {
    }
    %c0 = arith.constant 0 : index
    %c0_1 = arith.constant 0 : index
    %3 = vector.load %arg1[%c0, %c0_1] : memref<16x40xf32, #tpu.memory_space<vmem>>, vector<16x40xf32>
    %c0_2 = arith.constant 0 : index
    %c0_3 = arith.constant 0 : index
    %4 = vector.load %arg2[%c0_2, %c0_3] : memref<16x1xi32, #tpu.memory_space<vmem>>, vector<16x1xi32>
    %cst = arith.constant dense<0xFF800000> : vector<16xf32>
    %5 = vector.multi_reduction <maximumf>, %3, %cst [1] : vector<16x40xf32> to vector<16xf32>
    %6 = vector.shape_cast %5 : vector<16xf32> to vector<16x1xf32>
    %7 = vector.broadcast %6 : vector<16x1xf32> to vector<16x40xf32>
    %8 = arith.subf %3, %7 : vector<16x40xf32>
    %9 = math.exp %8 : vector<16x40xf32>
    %cst_4 = arith.constant dense<0.000000e+00> : vector<16xf32>
    %10 = vector.multi_reduction <add>, %9, %cst_4 [1] : vector<16x40xf32> to vector<16xf32>
    %11 = vector.shape_cast %10 : vector<16xf32> to vector<16x1xf32>
    %12 = math.log %11 : vector<16x1xf32>
    %13 = arith.addf %12, %6 : vector<16x1xf32>
    %14 = tpu.iota {dimensions = array<i32: 1>} : vector<16x40xi32>
    %15 = vector.broadcast %4 : vector<16x1xi32> to vector<16x40xi32>
    %16 = arith.cmpi eq, %14, %15 : vector<16x40xi32>
    %cst_5 = arith.constant 0.000000e+00 : f32
    %17 = vector.broadcast %cst_5 : f32 to vector<16x40xf32>
    %18 = arith.select %16, %3, %17 : vector<16x40xi1>, vector<16x40xf32>
    %cst_6 = arith.constant dense<0.000000e+00> : vector<16xf32>
    %19 = vector.multi_reduction <add>, %18, %cst_6 [1] : vector<16x40xf32> to vector<16xf32>
    %20 = vector.shape_cast %19 : vector<16xf32> to vector<16x1xf32>
    %c0_i32_7 = arith.constant 0 : i32
    %21 = vector.broadcast %c0_i32_7 : i32 to vector<16x1xi32>
    %22 = arith.cmpi ne, %4, %21 : vector<16x1xi32>
    %23 = arith.extui %22 : vector<16x1xi1> to vector<16x1xi32>
    %24 = arith.sitofp %23 : vector<16x1xi32> to vector<16x1xf32>
    %c0_8 = arith.constant 0 : index
    %c0_9 = arith.constant 0 : index
    %25 = vector.load %arg3[%c0_8, %c0_9] : memref<1x1xf32, #tpu.memory_space<vmem>>, vector<1x1xf32>
    %26 = arith.subf %13, %20 : vector<16x1xf32>
    %27 = arith.mulf %26, %24 : vector<16x1xf32>
    %28 = vector.shape_cast %27 : vector<16x1xf32> to vector<1x16x1xf32>
    %cst_10 = arith.constant dense<0.000000e+00> : vector<1xf32>
    %29 = vector.multi_reduction <add>, %28, %cst_10 [1, 2] : vector<1x16x1xf32> to vector<1xf32>
    %30 = vector.shape_cast %29 : vector<1xf32> to vector<1x1x1xf32>
    %31 = vector.extract %30[0, 0, 0] : f32 from vector<1x1x1xf32>
    %32 = vector.broadcast %31 : f32 to vector<1x1xf32>
    %33 = arith.addf %25, %32 : vector<1x1xf32>
    %c0_11 = arith.constant 0 : index
    %c0_12 = arith.constant 0 : index
    %34 = vector.load %arg3[%c0_11, %c0_12] : memref<1x1xf32, #tpu.memory_space<vmem>>, vector<1x1xf32>
    tpu.vector_store %arg3[%c0_11, %c0_12], %33 {strides = array<i32>} : memref<1x1xf32, #tpu.memory_space<vmem>>, vector<1x1xf32>,
    %c0_13 = arith.constant 0 : index
    %c0_14 = arith.constant 0 : index
    %35 = vector.load %arg4[%c0_13, %c0_14] : memref<1x1xf32, #tpu.memory_space<vmem>>, vector<1x1xf32>
    %36 = vector.shape_cast %24 : vector<16x1xf32> to vector<1x16x1xf32>
    %cst_15 = arith.constant dense<0.000000e+00> : vector<1xf32>
    %37 = vector.multi_reduction <add>, %36, %cst_15 [1, 2] : vector<1x16x1xf32> to vector<1xf32>
    %38 = vector.shape_cast %37 : vector<1xf32> to vector<1x1x1xf32>
    %39 = vector.extract %38[0, 0, 0] : f32 from vector<1x1x1xf32>
    %40 = vector.broadcast %39 : f32 to vector<1x1xf32>
    %41 = arith.addf %35, %40 : vector<1x1xf32>
    %c0_16 = arith.constant 0 : index
    %c0_17 = arith.constant 0 : index
    %42 = vector.load %arg4[%c0_16, %c0_17] : memref<1x1xf32, #tpu.memory_space<vmem>>, vector<1x1xf32>
    tpu.vector_store %arg4[%c0_16, %c0_17], %41 {strides = array<i32>} : memref<1x1xf32, #tpu.memory_space<vmem>>, vector<1x1xf32>,
    return
  }
  func.func @transform_0(%arg0: i32) -> (i32, i32) {
    %c0_i32 = arith.constant 0 : i32
    %c0_i32_0 = arith.constant 0 : i32
    return %arg0, %c0_i32 : i32, i32
  }
  func.func @transform_1(%arg0: i32) -> (i32, i32) {
    %c0_i32 = arith.constant 0 : i32
    %c0_i32_0 = arith.constant 0 : i32
    return %arg0, %c0_i32 : i32, i32
  }
  func.func @transform_2(%arg0: i32) -> (i32, i32) {
    %c0_i32 = arith.constant 0 : i32
    %c0_i32_0 = arith.constant 0 : i32
    %c0_i32_1 = arith.constant 0 : i32
    return %c0_i32, %c0_i32_0 : i32, i32
  }
  func.func @transform_3(%arg0: i32) -> (i32, i32) {
    %c0_i32 = arith.constant 0 : i32
    %c0_i32_0 = arith.constant 0 : i32
    %c0_i32_1 = arith.constant 0 : i32
    return %c0_i32, %c0_i32_0 : i32, i32
  }
}

</mosaic_0001>

<bundles_post_ra>
// kernel: run.20
= control target key start
LH: loop header
LB: loop body
LE: loop exit
PB: predicated region body
PF: predicated region fallthrough
CT: control target
= control target key end

     0   :  { %vm27_vm0 = vcmask 261120   ;;  %vm81_vm1 = vcmask 257024   ;;  %s153_s0 = inlined_call_operand.vmem [shape: bf16[16,32], index: 0, kind: input, shape index: {}]   ;;  %s154_s1 = inlined_call_operand.vmem [shape: bf16[16,32], index: 1, kind: input, shape index: {}]   ;;  %s155_s2 = inlined_call_operand.vmem [shape: f32[1,32], index: 2, kind: input, shape index: {}]   ;;  %s156_s3 = inlined_call_operand.vmem [shape: f32[1,32], index: 3, kind: input, shape index: {}]   ;;  %s157_s4 = inlined_call_operand.vmem [shape: bf16[16,32], index: 4, kind: output, shape index: {}]  }
   0x1   :  { %v95_v0 = vld [vmem:[%s153_s0] sm:$0xff]  }
   0x2   :  { %v99_v1 = vld [vmem:[%s154_s1] sm:$0xff]   ;;  %v96_v2 = vunpack.c.l.bf16 %v95_v0  ;;  %v97_v4 = vunpack.c.h.bf16 %v95_v0 }
   0x3   :  { %v100_v3 = vunpack.c.l.bf16 %v99_v1  ;;  %v101_v5 = vunpack.c.h.bf16 %v99_v1  ;;  %v88_v27 = vld [vmem:[%s155_s2] ss:$0 sm:$0xff] }
   0x4   :  { %v89_v29 = vld [vmem:[%s156_s3] ss:$0 sm:$0xff] }
   0x5   :  { %v25_v6 = vadd.f32 %v100_v3, %v96_v2  ;;  %v26_v7 = vadd.f32 %v101_v5, %v97_v4 }
   0x7   :  { %v28_v8 = vsel %vm27_vm0, %v25_v6, 0.0  ;;  %v31_v9 = vsel %vm27_vm0, %v26_v7, 0.0 }
   0x8   :  { %29 = vadd.xlane.f32.xlu0 %v28_v8 }
   0xc   :  { %32 = vadd.xlane.f32.xlu0 %v31_v9 }
  0x91   :  { %v30_v10 = vpop.xlane.xlu0 %29 }
  0x92   :  { %v35_v11 = vmul.f32 0.03125, %v30_v10 }
  0x94   :  { %v37_v12 = vsub.f32 %v25_v6, %v35_v11 }
  0x95   :  { %v33_v13 = vpop.xlane.xlu0 %32 }
  0x96   :  { %v36_v14 = vmul.f32 0.03125, %v33_v13  ;;  %v39_v15 = vmul.f32 %v37_v12, %v37_v12 }
  0x98   :  { %v38_v16 = vsub.f32 %v26_v7, %v36_v14  ;;  %v41_v17 = vsel %vm27_vm0, %v39_v15, 0.0 }
  0x99   :  { %42 = vadd.xlane.f32.xlu1 %v41_v17 }
  0x9a   :  { %v40_v18 = vmul.f32 %v38_v16, %v38_v16 }
  0x9c   :  { %v44_v19 = vsel %vm27_vm0, %v40_v18, 0.0 }
  0x9d   :  { %45 = vadd.xlane.f32.xlu1 %v44_v19 }
 0x122   :  { %v43_v20 = vpop.xlane.xlu1 %42 }
 0x123   :  { %v47_v21 = vmul.f32 0.03125, %v43_v20 }
 0x125   :  { %v49_v22 = vadd.f32 1e-05, %v47_v21 }
 0x126   :  { %v46_v23 = vpop.xlane.xlu1 %45 }
 0x127   :  { %102 = vrsqrt.f32 %v49_v22  ;;  %v48_v24 = vmul.f32 0.03125, %v46_v23 }
 0x129   :  { %v50_v25 = vadd.f32 1e-05, %v48_v24 }
 0x12b   :  { %104 = vrsqrt.f32 %v50_v25 }
 0x134   :  { %v103_v26 = vpop.eup %102 }
 0x135   :  { %v53_v28 = vmul.f32 %v103_v26, %v37_v12 }
 0x137   :  { %v62_v30 = vmul.f32 %v88_v27, %v53_v28 }
 0x138   :  { %v105_v31 = vpop.eup %104 }
 0x139   :  { %v71_v32 = vadd.f32 %v89_v29, %v62_v30  ;;  %v54_v33 = vmul.f32 %v105_v31, %v38_v16 }
 0x13b   :  { %v92_v34 = vpack.c.bf16 %v71_v32, %v71_v32  ;;  %v63_v35 = vmul.f32 %v88_v27, %v54_v33 }
 0x13d   :  { %82 = vst.msk [vmem:[%s157_s4] sm:$0xf] %vm81_vm1, %v92_v34  ;;  %v72_v36 = vadd.f32 %v89_v29, %v63_v35 }
 0x13f   :  { %v93_v37 = vpack.c.bf16 %v72_v36, %v72_v36 }
 0x141   :  { %83 = vst.msk [vmem:[%s157_s4 + $0x4] sm:$0xf] %vm81_vm1, %v93_v37 }

// kernel: run.19
= control target key start
LH: loop header
LB: loop body
LE: loop exit
PB: predicated region body
PF: predicated region fallthrough
CT: control target
= control target key end

     0   :  { %vm19_vm0 = vcmask 261120   ;;  %v150_v0 = vmov 0.0   ;;  %vm151_vm1 = vmmov 0   ;;  %vm118_vm2 = vcmask 257024   ;;  %s195_s1 = inlined_call_operand.vmem [shape: bf16[32,32], index: 1, kind: input, shape index: {}]   ;;  %s196_s0 = inlined_call_operand.vmem [shape: bf16[16,32], index: 0, kind: input, shape index: {}]   ;;  %s197_s2 = inlined_call_operand.vmem [shape: f32[1,32], index: 2, kind: input, shape index: {}]   ;;  %s198_s3 = inlined_call_operand.vmem [shape: bf16[16,32], index: 3, kind: output, shape index: {}]  }
   0x1   :  { %137 = vmatprep.subr.bf16.mxu0 %v150_v0  ;;  %v147_v1 = vld [vmem:[%s195_s1 + $0x8] sm:$0xff]   ;;  %141 = vmatprep.mubr.msk.bf16.mxu0 %vm151_vm1, %v150_v0  ;;  %20 = vst.msk [vmem:[#allocation2] sm:$0xff] %vm19_vm0, %v150_v0  ;;  %21 = vst.msk [vmem:[#allocation2 + $0x8] sm:$0xff] %vm19_vm0, %v150_v0  ;;  %v148_v2 = vld [vmem:[%s195_s1] sm:$0xff]  }
   0x2   :  { %138 = vmatpush3.bf16.msra.mxu0 %v147_v1  ;;  %v149_v3 = vld [vmem:[%s196_s0] sm:$0xff]  }
   0x3   :  { %139 = vmatprep.subr.bf16.mxu0 %v150_v0  ;;  %v129_v12 = vld [vmem:[%s197_s2] ss:$0 sm:$0xff] }
   0x6   :  { %140 = vmatpush3.bf16.msra.mxu0 %v148_v2 }
   0x8   :  { %v22_v4 = vld [vmem:[#allocation2] sm:$0xff]  ;;  %v23_v8 = vld [vmem:[#allocation2 + $0x8] sm:$0xff] }
   0x9   :  { %142 = vmatmul.mubr.msk.bf16.vlgmr.msra.gmra.mxu0 %vm19_vm0, %v149_v3 }
  0xc9   :  { %v85_v5 = vpop.f32.mrf.mxu0 }
  0xca   :  { %v92_v6 = vadd.f32 %v85_v5, %v22_v4 }
  0xcb   :  { %v143_v7 = vpop.f32.mrf.mxu0 }
  0xcc   :  { %94 = vst.msk [vmem:[#allocation2] sm:$0xff] %vm19_vm0, %v92_v6 }
  0xcd   :  { %v88_v9 = vpop.f32.mrf.mxu0 }
  0xce   :  { %v93_v10 = vadd.f32 %v88_v9, %v23_v8 }
  0xcf   :  { %v144_v11 = vpop.f32.mrf.mxu0 }
  0xd0   :  { %95 = vst.msk [vmem:[#allocation2 + $0x8] sm:$0xff] %vm19_vm0, %v93_v10 }
  0xd3   :  { %v99_v13 = vld [vmem:[#allocation2] sm:$0xff] }
  0xd4   :  { %v108_v14 = vadd.f32 %v129_v12, %v99_v13 }
  0xd6   :  { %v132_v15 = vpack.c.bf16 %v108_v14, %v108_v14 }
  0xd7   :  { %v100_v16 = vld [vmem:[#allocation2 + $0x8] sm:$0xff] }
  0xd8   :  { %119 = vst.msk [vmem:[%s198_s3] sm:$0xf] %vm118_vm2, %v132_v15  ;;  %v109_v17 = vadd.f32 %v129_v12, %v100_v16 }
  0xda   :  { %v133_v18 = vpack.c.bf16 %v109_v17, %v109_v17 }
  0xdc   :  { %120 = vst.msk [vmem:[%s198_s3 + $0x4] sm:$0xf] %vm118_vm2, %v133_v18 }

// kernel: run.17
= control target key start
LH: loop header
LB: loop body
LE: loop exit
PB: predicated region body
PF: predicated region fallthrough
CT: control target
= control target key end

     0   :  { %vm19_vm0 = vcmask 785408   ;;  %v151_v0 = vmov 0.0   ;;  %vm152_vm1 = vmmov 0   ;;  %vm47_vm2 = vcmask 261120   ;;  %s195_s1 = inlined_call_operand.vmem [shape: bf16[32,96], index: 1, kind: input, shape index: {}]   ;;  %s196_s0 = inlined_call_operand.vmem [shape: bf16[16,32], index: 0, kind: input, shape index: {}]   ;;  %s197_s2 = inlined_call_operand.vmem [shape: f32[1,96], index: 2, kind: input, shape index: {}]   ;;  %s198_s3 = inlined_call_operand.vmem [shape: bf16[16,96], index: 3, kind: output, shape index: {}]  }
   0x1   :  { %138 = vmatprep.subr.bf16.mxu0 %v151_v0  ;;  %v148_v1 = vld [vmem:[%s195_s1 + $0x8] sm:$0xff]   ;;  %142 = vmatprep.mubr.msk.bf16.mxu0 %vm152_vm1, %v151_v0  ;;  %20 = vst.msk [vmem:[#allocation2] sm:$0xff] %vm19_vm0, %v151_v0  ;;  %21 = vst.msk [vmem:[#allocation2 + $0x8] sm:$0xff] %vm19_vm0, %v151_v0  ;;  %v149_v2 = vld [vmem:[%s195_s1] sm:$0xff]   ;;  %vm119_vm3 = vcmask 781312  }
   0x2   :  { %139 = vmatpush3.bf16.msra.mxu0 %v148_v1  ;;  %v150_v3 = vld [vmem:[%s196_s0] sm:$0xff]  }
   0x3   :  { %140 = vmatprep.subr.bf16.mxu0 %v151_v0  ;;  %v130_v12 = vld [vmem:[%s197_s2] ss:$0 sm:$0xff] }
   0x6   :  { %141 = vmatpush3.bf16.msra.mxu0 %v149_v2 }
   0x8   :  { %v22_v4 = vld [vmem:[#allocation2] sm:$0xff]  ;;  %v23_v8 = vld [vmem:[#allocation2 + $0x8] sm:$0xff] }
   0x9   :  { %143 = vmatmul.mubr.msk.bf16.vlgmr.msra.gmra.mxu0 %vm47_vm2, %v150_v3 }
  0xc9   :  { %v85_v5 = vpop.f32.mrf.mxu0 }
  0xca   :  { %v92_v6 = vadd.f32 %v85_v5, %v22_v4 }
  0xcb   :  { %v144_v7 = vpop.f32.mrf.mxu0 }
  0xcc   :  { %95 = vst.msk [vmem:[#allocation2] sm:$0xff] %vm19_vm0, %v92_v6 }
  0xcd   :  { %v88_v9 = vpop.f32.mrf.mxu0 }
  0xce   :  { %v93_v10 = vadd.f32 %v88_v9, %v23_v8 }
  0xcf   :  { %v145_v11 = vpop.f32.mrf.mxu0 }
  0xd0   :  { %96 = vst.msk [vmem:[#allocation2 + $0x8] sm:$0xff] %vm19_vm0, %v93_v10 }
  0xd3   :  { %v100_v13 = vld [vmem:[#allocation2] sm:$0xff] }
  0xd4   :  { %v109_v14 = vadd.f32 %v130_v12, %v100_v13 }
  0xd6   :  { %v133_v15 = vpack.c.bf16 %v109_v14, %v109_v14 }
  0xd7   :  { %v101_v16 = vld [vmem:[#allocation2 + $0x8] sm:$0xff] }
  0xd8   :  { %120 = vst.msk [vmem:[%s198_s3] sm:$0xf] %vm119_vm3, %v133_v15  ;;  %v110_v17 = vadd.f32 %v130_v12, %v101_v16 }
  0xda   :  { %v134_v18 = vpack.c.bf16 %v110_v17, %v110_v17 }
  0xdc   :  { %121 = vst.msk [vmem:[%s198_s3 + $0x4] sm:$0xf] %vm119_vm3, %v134_v18 }

// kernel: run.18
= control target key start
LH: loop header
LB: loop body
LE: loop exit
PB: predicated region body
PF: predicated region fallthrough
CT: control target
= control target key end

     0   :  { %s867_s9 = smov 0   ;;  %s966_s0 = inlined_call_operand.vmem [shape: bf16[2,8,96], index: 0, kind: input, shape index: {}]   ;;  %s967_s1 = inlined_call_operand.vmem [shape: f32[2,1,8], index: 1, kind: input, shape index: {}]   ;;  %s968_s2 = inlined_call_operand.vmem [shape: bf16[2,8,32], index: 2, kind: output, shape index: {}]  }
   0x1 LB: > { %s702_s10 = sadd.s32 4294967295, %s833_s9   ;;  %p706_p0 = scmp.ge.s32.totalorder %s833_s9, 1  ;;  %s833_s9 = sphi %s867_s9, %s12_s9  }
   0x2   : > { %p119_p1 = scmp.lt.s32.totalorder %s833_s9, 3 }
   0x4   : > { %p120_p2 = pnand %p706_p0, %p119_p1 }
   0x5   : > { %p142_p3 = scmp.lt.s32.totalorder (!%p120_p2), %s702_s10, 1  ;;  %s837_s15 = smov (!%p120_p2), 96  }
   0x6   : > { %123 = sbr.rel (%p120_p2) target bundleno = 1543 (0x607), region = 28  ;;  %s838_s16 = smov (!%p120_p2), 64  }
   0x7   : > { %s839_s17 = smov (!%p120_p2), 88   ;;  %s841_s21 = smov (!%p120_p2), 72  }
   0x8   : > { %s842_s22 = smov (!%p120_p2), 120   ;;  %s843_s23 = smov (!%p120_p2), 80  }
   0x9   : > { %s844_s24 = smov (!%p120_p2), 112   ;;  %s845_s25 = smov (!%p120_p2), 104  }
   0xa   : > { %s846_s26 = smov (!%p120_p2), 56   ;;  %s847_s27 = smov (!%p120_p2), 48  }
   0xb   : > { %v835_v0 = vmov 0.0   ;;  %vm836_vm0 = vmmov 0   ;;  %s970_s10 = smov (!%p142_p3, %s702_s10), 1  ;;  %vm174_vm1 = vcmask 64512   ;;  %v156_v5 = vlaneseq  ;;  %s848_s28 = smov 40  }
   0xc   : > { %737 = vmatprep.subr.bf16.mxu0 %v835_v0  ;;  %739 = vmatprep.mubr.msk.bf16.mxu0 %vm836_vm0, %v835_v0  ;;  %s707_s11 = sshll.u32 %s970_s10, 2  ;;  %s148_s20 = scalar_lea.vmem %s967_s1, %s970_s10  ;;  %v840_v9 = vmov -1e+30   ;;  %vm240_vm3 = vcmask 1043456   ;;  %vm633_vm4 = vcmask 130048   ;;  %vm635_vm5 = vcmask 195584  }
   0xd   : > { %743 = vmatprep.subr.bf16.mxu1 %v835_v0  ;;  %745 = vmatprep.mubr.msk.bf16.mxu1 %vm836_vm0, %v835_v0  ;;  %s145_s14 = scalar_lea.vmem %s966_s0, %s707_s11  ;;  %v157_v6 = vshrl.u32 %v156_v5, 7  ;;  %v159_v7 = vand.u32 127, %v156_v5  ;;  %v709_v8 = vld [vmem:[%s148_s20] ss:$0 sm:$0xff]  ;;  %s849_s29 = smov 8   ;;  %vm638_vm6 = vcmask 257024  }
   0xe   : > { %v154_v1 = vld [vmem:[%s145_s14] sm:$0xf]  ;;  %s850_s30 = smov 16   ;;  %s851_s3 = smov 24  }
   0xf   : > { %v889_v2 = vcombine.low %v154_v1, %v154_v1  ;;  %vm160_vm2 = vcmp.ge.s32.totalorder %v157_v6, %v159_v7  ;;  %s152_s6 = scalar_lea.vmem %s968_s2, %s707_s11 }
  0x10   : > { %v161_v10 = vsel %vm160_vm2, 0.0, %v840_v9 }
  0x11   : > { %172 = vrot.lane.b32.xlu0 %v889_v2, %s837_s15  ;;  %235 = vrot.lane.b32.xlu1 %v889_v2, %s838_s16  ;;  %v903_v11 = vadd.f32 %v709_v8, %v161_v10 }
  0x15   : > { %286 = vrot.lane.b32.xlu1 %v889_v2, %s839_s17 }
  0x83   : > { %v173_v3 = vpop.permute.xlu0 %172  ;;  %v236_v19 = vpop.permute.xlu1 %235 }
  0x84   : > { %v179_v4 = vsel %vm174_vm1, %v173_v3, 0  ;;  %v242_v20 = vsel %vm240_vm3, %v236_v19, 0 }
  0x85   : > { %738 = vmatpush3.bf16.xpose.msra.mxu0 %v179_v4  ;;  %744 = vmatpush3.bf16.msra.mxu1 %v242_v20 }
  0x86   : > { %755 = vmatprep.subr.bf16.mxu0 %v835_v0  ;;  %749 = vmatprep.subr.bf16.mxu1 %v835_v0 }
  0x87   : > { %v287_v26 = vpop.permute.xlu1 %286 }
  0x88   : > { %v292_v32 = vsel %vm174_vm1, %v287_v26, 0 }
  0x8c   : > { %740 = vmatmul.mubr.msk.bf16.vlgmr.msra.gmra.mxu0 %vm174_vm1, %v154_v1 }
  0x8d   : > { %757 = vmatprep.mubr.msk.bf16.mxu0 %vm836_vm0, %v835_v0 }
 0x14c   : > { %v215_v12 = vpop.f32.mrf.mxu0 }
 0x14d   : > { %v221_v13 = vmul.f32 0.35355338, %v215_v12 }
 0x14e   : > { %v741_v14 = vpop.f32.mrf.mxu0 }
 0x14f   : > { %v222_v15 = vadd.f32 %v221_v13, %v903_v11 }
 0x150   : > { %v218_v16 = vpop.f32.mrf.mxu0 }
 0x151   : > { %v223_v17 = vsel %vm174_vm1, %v222_v15, -inf }
 0x152   : > { %224 = vmax.xlane.f32.xlu0 %v223_v17  ;;  %v742_v18 = vpop.f32.mrf.mxu0 }
 0x168   : > { %510 = vrot.lane.b32.xlu0 %v889_v2, %s841_s21 }
 0x1db   : > { %v225_v21 = vpop.xlane.xlu0 %224 }
 0x1dc   : > { %v226_v22 = vsub.f32 %v222_v15, %v225_v21 }
 0x1de   : > { %v227_v23 = vmul.f32 1.442695, %v226_v22 }
 0x1df   : > { %v511_v35 = vpop.permute.xlu0 %510 }
 0x1e0   : > { %811 = vpow2.f32 %v227_v23  ;;  %v516_v37 = vsel %vm174_vm1, %v511_v35, 0 }
 0x1ed   : > { %v812_v24 = vpop.eup %811 }
 0x1ee   : > { %v229_v25 = vsel %vm174_vm1, %v812_v24, 0.0 }
 0x1ef   : > { %230 = vadd.xlane.f32.xlu1 %v229_v25 }
 0x200   : > { %284 = vrot.lane.b32.xlu1 %v889_v2, %s842_s22 }
 0x204   : > { %398 = vrot.lane.b32.xlu1 %v889_v2, %s843_s23 }
 0x208   : > { %396 = vrot.lane.b32.xlu1 %v889_v2, %s844_s24 }
 0x20c   : > { %508 = vrot.lane.b32.xlu1 %v889_v2, %s845_s25 }
 0x278   : > { %v231_v27 = vpop.xlane.xlu1 %230 }
 0x279   : > { %813 = vrcp.f32 %v231_v27 }
 0x27c   : > { %v285_v30 = vpop.permute.xlu1 %284 }
 0x280   : > { %v399_v33 = vpop.permute.xlu1 %398 }
 0x281   : > { %v404_v34 = vsel %vm174_vm1, %v399_v33, 0 }
 0x284   : > { %v397_v36 = vpop.permute.xlu1 %396 }
 0x286   : > { %v814_v28 = vpop.eup %813 }
 0x287   : > { %v233_v29 = vmul.f32 %v814_v28, %v812_v24 }
 0x288   : > { %v509_v38 = vpop.permute.xlu1 %508 }
 0x289   : > { %v234_v31 = vpack.c.bf16 %v233_v29, %v233_v29 }
 0x28b   : > { %746 = vmatmul.mubr.msk.bf16.vlgmr.msra.gmra.mxu1 %vm174_vm1, %v234_v31 }
 0x28c   : > { %750 = vmatpush3.bf16.xpose.msra.mxu1 %v292_v32  ;;  %751 = vmatprep.mubr.msk.bf16.mxu1 %vm836_vm0, %v835_v0 }
 0x28d   : > { %761 = vmatprep.subr.bf16.mxu1 %v835_v0 }
 0x293   : > { %752 = vmatmul.mubr.msk.bf16.vlgmr.msra.gmra.mxu1 %vm174_vm1, %v285_v30 }
 0x294   : > { %762 = vmatpush3.bf16.xpose.msra.mxu1 %v404_v34  ;;  %763 = vmatprep.mubr.msk.bf16.mxu1 %vm836_vm0, %v835_v0 }
 0x295   : > { %773 = vmatprep.subr.bf16.mxu1 %v835_v0 }
 0x29b   : > { %764 = vmatmul.mubr.msk.bf16.vlgmr.msra.gmra.mxu1 %vm174_vm1, %v397_v36 }
 0x29c   : > { %774 = vmatpush3.bf16.xpose.msra.mxu1 %v516_v37  ;;  %775 = vmatprep.mubr.msk.bf16.mxu1 %vm836_vm0, %v835_v0 }
 0x2a3   : > { %776 = vmatmul.mubr.msk.bf16.vlgmr.msra.gmra.mxu1 %vm174_vm1, %v509_v38 }
 0x34b   : > { %v930_v39 = vpop.f32.mrf.mxu1 }
 0x34d   : > { %v747_v40 = vpop.f32.mrf.mxu1 }
 0x34f   : > { %v281_v41 = vpop.f32.mrf.mxu1 }
 0x351   : > { %v748_v42 = vpop.f32.mrf.mxu1 }
 0x353   : > { %v328_v43 = vpop.f32.mrf.mxu1 }
 0x354   : > { %v334_v44 = vmul.f32 0.35355338, %v328_v43 }
 0x355   : > { %v753_v45 = vpop.f32.mrf.mxu1 }
 0x356   : > { %v335_v46 = vadd.f32 %v334_v44, %v903_v11 }
 0x357   : > { %v331_v47 = vpop.f32.mrf.mxu1 }
 0x358   : > { %v336_v48 = vsel %vm174_vm1, %v335_v46, -inf }
 0x359   : > { %337 = vmax.xlane.f32.xlu1 %v336_v48  ;;  %v754_v49 = vpop.f32.mrf.mxu1 }
 0x35b   : > { %v440_v50 = vpop.f32.mrf.mxu1 }
 0x35c   : > { %v446_v51 = vmul.f32 0.35355338, %v440_v50 }
 0x35d   : > { %v765_v52 = vpop.f32.mrf.mxu1 }
 0x35e   : > { %v447_v53 = vadd.f32 %v446_v51, %v903_v11 }
 0x35f   : > { %v443_v54 = vpop.f32.mrf.mxu1 }
 0x360   : > { %v448_v55 = vsel %vm174_vm1, %v447_v53, -inf }
 0x361   : > { %449 = vmax.xlane.f32.xlu0 %v448_v55  ;;  %v766_v56 = vpop.f32.mrf.mxu1 }
 0x363   : > { %v552_v57 = vpop.f32.mrf.mxu1 }
 0x364   : > { %v558_v58 = vmul.f32 0.35355338, %v552_v57 }
 0x365   : > { %v777_v59 = vpop.f32.mrf.mxu1 }
 0x366   : > { %v559_v60 = vadd.f32 %v558_v58, %v903_v11 }
 0x367   : > { %v555_v61 = vpop.f32.mrf.mxu1 }
 0x368   : > { %v560_v62 = vsel %vm174_vm1, %v559_v60, -inf }
 0x369   : > { %561 = vmax.xlane.f32.xlu1 %v560_v62  ;;  %v778_v63 = vpop.f32.mrf.mxu1 }
 0x3e2   : > { %v338_v1 = vpop.xlane.xlu1 %337 }
 0x3e3   : > { %v339_v3 = vsub.f32 %v335_v46, %v338_v1 }
 0x3e5   : > { %v340_v4 = vmul.f32 1.442695, %v339_v3 }
 0x3e7   : > { %815 = vpow2.f32 %v340_v4 }
 0x3ea   : > { %v450_v12 = vpop.xlane.xlu0 %449 }
 0x3eb   : > { %v451_v13 = vsub.f32 %v447_v53, %v450_v12 }
 0x3ed   : > { %v452_v14 = vmul.f32 1.442695, %v451_v13 }
 0x3f2   : > { %v562_v5 = vpop.xlane.xlu1 %561 }
 0x3f3   : > { %v563_v6 = vsub.f32 %v559_v60, %v562_v5 }
 0x3f4   : > { %v816_v7 = vpop.eup %815 }
 0x3f5   : > { %v564_v8 = vmul.f32 1.442695, %v563_v6  ;;  %v342_v9 = vsel %vm174_vm1, %v816_v7, 0.0 }
 0x3f6   : > { %343 = vadd.xlane.f32.xlu1 %v342_v9 }
 0x3f7   : > { %817 = vpow2.f32 %v564_v8 }
 0x3f8   : > { %819 = vpow2.f32 %v452_v14 }
 0x404   : > { %v818_v10 = vpop.eup %817 }
 0x405   : > { %v566_v11 = vsel %vm174_vm1, %v818_v10, 0.0  ;;  %v820_v15 = vpop.eup %819 }
 0x406   : > { %567 = vadd.xlane.f32.xlu0 %v566_v11  ;;  %v454_v16 = vsel %vm174_vm1, %v820_v15, 0.0 }
 0x407   : > { %348 = vrot.lane.b32.xlu1 %v889_v2, %s846_s26 }
 0x41c   : > { %460 = vrot.lane.b32.xlu0 %v889_v2, %s847_s27 }
 0x42b   : > { %455 = vadd.xlane.f32.xlu1 %v454_v16 }
 0x43c   : > { %572 = vrot.lane.b32.xlu1 %v889_v2, %s848_s28 }
 0x47f   : > { %v344_v17 = vpop.xlane.xlu1 %343 }
 0x480   : > { %821 = vrcp.f32 %v344_v17 }
 0x483   : > { %v349_v18 = vpop.permute.xlu1 %348 }
 0x484   : > { %v354_v19 = vsel %vm240_vm3, %v349_v18, 0 }
 0x485   : > { %756 = vmatpush3.bf16.msra.mxu0 %v354_v19 }
 0x486   : > { %767 = vmatprep.subr.bf16.mxu0 %v835_v0 }
 0x48d   : > { %v822_v20 = vpop.eup %821 }
 0x48e   : > { %v346_v21 = vmul.f32 %v822_v20, %v816_v7 }
 0x48f   : > { %v568_v22 = vpop.xlane.xlu0 %567 }
 0x490   : > { %v347_v23 = vpack.c.bf16 %v346_v21, %v346_v21 }
 0x492   : > { %758 = vmatmul.mubr.msk.bf16.vlgmr.msra.gmra.mxu0 %vm174_vm1, %v347_v23 }
 0x493   : > { %v461_v24 = vpop.permute.xlu0 %460  ;;  %769 = vmatprep.mubr.msk.bf16.mxu0 %vm836_vm0, %v835_v0 }
 0x494   : > { %v466_v2 = vsel %vm240_vm3, %v461_v24, 0 }
 0x495   : > { %768 = vmatpush3.bf16.msra.mxu0 %v466_v2 }
 0x496   : > { %779 = vmatprep.subr.bf16.mxu0 %v835_v0 }
 0x4b4   : > { %v456_v25 = vpop.xlane.xlu1 %455 }
 0x4b5   : > { %823 = vrcp.f32 %v456_v25 }
 0x4b6   : > { %825 = vrcp.f32 %v568_v22 }
 0x4b8   : > { %v573_v27 = vpop.permute.xlu1 %572 }
 0x4b9   : > { %v578_v29 = vsel %vm240_vm3, %v573_v27, 0 }
 0x4c2   : > { %v824_v26 = vpop.eup %823 }
 0x4c3   : > { %v458_v28 = vmul.f32 %v824_v26, %v820_v15  ;;  %v826_v31 = vpop.eup %825 }
 0x4c4   : > { %v570_v32 = vmul.f32 %v826_v31, %v818_v10 }
 0x4c5   : > { %v459_v30 = vpack.c.bf16 %v458_v28, %v458_v28 }
 0x4c6   : > { %v571_v33 = vpack.c.bf16 %v570_v32, %v570_v32 }
 0x4c7   : > { %770 = vmatmul.mubr.msk.bf16.vlgmr.msra.gmra.mxu0 %vm174_vm1, %v459_v30 }
 0x4c8   : > { %780 = vmatpush3.bf16.msra.mxu0 %v578_v29  ;;  %781 = vmatprep.mubr.msk.bf16.mxu0 %vm836_vm0, %v835_v0 }
 0x4cf   : > { %782 = vmatmul.mubr.msk.bf16.vlgmr.msra.gmra.mxu0 %vm174_vm1, %v571_v33 }
 0x552   : > { %v390_v34 = vpop.f32.mrf.mxu0 }
 0x553   : > { %621 = vrot.lane.b32.xlu1 %v390_v34, %s849_s29 }
 0x554   : > { %v759_v35 = vpop.f32.mrf.mxu0 }
 0x556   : > { %v393_v36 = vpop.f32.mrf.mxu0 }
 0x558   : > { %v760_v37 = vpop.f32.mrf.mxu0 }
 0x587   : > { %v502_v38 = vpop.f32.mrf.mxu0 }
 0x588   : > { %625 = vrot.lane.b32.xlu0 %v502_v38, %s850_s30 }
 0x589   : > { %v771_v40 = vpop.f32.mrf.mxu0 }
 0x58b   : > { %v505_v41 = vpop.f32.mrf.mxu0 }
 0x58d   : > { %v772_v42 = vpop.f32.mrf.mxu0 }
 0x58f   : > { %v614_v43 = vpop.f32.mrf.mxu0 }
 0x590   : > { %629 = vrot.lane.b32.xlu1 %v614_v43, %s851_s3 }
 0x591   : > { %v783_v0 = vpop.f32.mrf.mxu0 }
 0x593   : > { %v617_v44 = vpop.f32.mrf.mxu0 }
 0x595   : > { %v784_v45 = vpop.f32.mrf.mxu0 }
 0x5c5   : > { %v622_v46 = vpop.permute.xlu1 %621 }
 0x5c6   : > { %v632_v48 = vsel %vm174_vm1, %v930_v39, %v622_v46 }
 0x5fa   : > { %v626_v47 = vpop.permute.xlu0 %625 }
 0x5fb   : > { %v634_v49 = vsel %vm633_vm4, %v632_v48, %v626_v47 }
 0x602   : > { %v630_v50 = vpop.permute.xlu1 %629 }
 0x603   : > { %v636_v51 = vsel %vm635_vm5, %v634_v49, %v630_v50 }
 0x604   : > { %v637_v52 = vpack.c.bf16 %v636_v51, %v636_v51 }
 0x606   : > { %639 = vst.msk [vmem:[%s152_s6] sm:$0xf] %vm638_vm6, %v637_v52 }
 0x607 PF: > { %s12_s9 = sadd.s32 1, %s833_s9  }
 0x608   : > { %p9_p4 = scmp.ge.s32.totalorder %s12_s9, 4  }
 0x60a   :  { %11 = sbr.rel (!%p9_p4) target bundleno = 1 (0x1), region = 61 }

// kernel: run.21
= control target key start
LH: loop header
LB: loop body
LE: loop exit
PB: predicated region body
PF: predicated region fallthrough
CT: control target
= control target key end

     0   :  { %vm19_vm0 = vcmask 523264   ;;  %v153_v0 = vmov 0.0   ;;  %vm154_vm1 = vmmov 0   ;;  %vm47_vm2 = vcmask 261120   ;;  %s197_s1 = inlined_call_operand.vmem [shape: bf16[32,64], index: 1, kind: input, shape index: {}]   ;;  %s198_s0 = inlined_call_operand.vmem [shape: bf16[16,32], index: 0, kind: input, shape index: {}]   ;;  %s199_s2 = inlined_call_operand.vmem [shape: f32[1,64], index: 2, kind: input, shape index: {}]   ;;  %s200_s3 = inlined_call_operand.vmem [shape: bf16[16,64], index: 3, kind: output, shape index: {}]  }
   0x1   :  { %140 = vmatprep.subr.bf16.mxu0 %v153_v0  ;;  %v150_v1 = vld [vmem:[%s197_s1 + $0x8] sm:$0xff]   ;;  %144 = vmatprep.mubr.msk.bf16.mxu0 %vm154_vm1, %v153_v0  ;;  %20 = vst.msk [vmem:[#allocation2] sm:$0xff] %vm19_vm0, %v153_v0  ;;  %21 = vst.msk [vmem:[#allocation2 + $0x8] sm:$0xff] %vm19_vm0, %v153_v0  ;;  %v151_v2 = vld [vmem:[%s197_s1] sm:$0xff]   ;;  %vm121_vm3 = vcmask 519168  }
   0x2   :  { %141 = vmatpush3.bf16.msra.mxu0 %v150_v1  ;;  %v152_v3 = vld [vmem:[%s198_s0] sm:$0xff]  }
   0x3   :  { %142 = vmatprep.subr.bf16.mxu0 %v153_v0  ;;  %v132_v12 = vld [vmem:[%s199_s2] ss:$0 sm:$0xff] }
   0x6   :  { %143 = vmatpush3.bf16.msra.mxu0 %v151_v2 }
   0x8   :  { %v22_v4 = vld [vmem:[#allocation2] sm:$0xff]  ;;  %v23_v8 = vld [vmem:[#allocation2 + $0x8] sm:$0xff] }
   0x9   :  { %145 = vmatmul.mubr.msk.bf16.vlgmr.msra.gmra.mxu0 %vm47_vm2, %v152_v3 }
  0xc9   :  { %v85_v5 = vpop.f32.mrf.mxu0 }
  0xca   :  { %v92_v6 = vadd.f32 %v85_v5, %v22_v4 }
  0xcb   :  { %v146_v7 = vpop.f32.mrf.mxu0 }
  0xcc   :  { %95 = vst.msk [vmem:[#allocation2] sm:$0xff] %vm19_vm0, %v92_v6 }
  0xcd   :  { %v88_v9 = vpop.f32.mrf.mxu0 }
  0xce   :  { %v93_v10 = vadd.f32 %v88_v9, %v23_v8 }
  0xcf   :  { %v147_v11 = vpop.f32.mrf.mxu0 }
  0xd0   :  { %96 = vst.msk [vmem:[#allocation2 + $0x8] sm:$0xff] %vm19_vm0, %v93_v10 }
  0xd3   :  { %v100_v13 = vld [vmem:[#allocation2] sm:$0xff] }
  0xd4   :  { %v109_v14 = vadd.f32 %v132_v12, %v100_v13 }
  0xd6   :  { %v111_v15 = vmax.f32 %v109_v14, 0.0 }
  0xd7   :  { %v101_v16 = vld [vmem:[#allocation2 + $0x8] sm:$0xff] }
  0xd8   :  { %v135_v17 = vpack.c.bf16 %v111_v15, %v111_v15  ;;  %v110_v18 = vadd.f32 %v132_v12, %v101_v16 }
  0xda   :  { %122 = vst.msk [vmem:[%s200_s3] sm:$0xf] %vm121_vm3, %v135_v17  ;;  %v112_v19 = vmax.f32 %v110_v18, 0.0 }
  0xdc   :  { %v136_v20 = vpack.c.bf16 %v112_v19, %v112_v19 }
  0xde   :  { %123 = vst.msk [vmem:[%s200_s3 + $0x4] sm:$0xf] %vm121_vm3, %v136_v20 }

// kernel: run.22
= control target key start
LH: loop header
LB: loop body
LE: loop exit
PB: predicated region body
PF: predicated region fallthrough
CT: control target
= control target key end

     0   :  { %vm19_vm0 = vcmask 261120   ;;  %v177_v0 = vmov 0.0   ;;  %vm178_vm1 = vmmov 0   ;;  %vm63_vm2 = vcmask 523264   ;;  %s227_s1 = inlined_call_operand.vmem [shape: bf16[64,32], index: 1, kind: input, shape index: {}]   ;;  %s228_s0 = inlined_call_operand.vmem [shape: bf16[16,64], index: 0, kind: input, shape index: {}]   ;;  %s229_s2 = inlined_call_operand.vmem [shape: f32[1,32], index: 2, kind: input, shape index: {}]   ;;  %s230_s3 = inlined_call_operand.vmem [shape: bf16[16,32], index: 3, kind: output, shape index: {}]  }
   0x1   :  { %158 = vmatprep.subr.bf16.mxu0 %v177_v0  ;;  %v172_v1 = vld [vmem:[%s227_s1 + $0x18] sm:$0xff]   ;;  %166 = vmatprep.mubr.msk.bf16.mxu0 %vm178_vm1, %v177_v0  ;;  %20 = vst.msk [vmem:[#allocation2] sm:$0xff] %vm19_vm0, %v177_v0  ;;  %21 = vst.msk [vmem:[#allocation2 + $0x8] sm:$0xff] %vm19_vm0, %v177_v0  ;;  %v173_v2 = vld [vmem:[%s227_s1 + $0x10] sm:$0xff]   ;;  %vm135_vm3 = vcmask 257024  }
   0x2   :  { %159 = vmatpush3.bf16.msra.mxu0 %v172_v1  ;;  %v174_v3 = vld [vmem:[%s227_s1 + $0x8] sm:$0xff]   ;;  %v175_v4 = vld [vmem:[%s227_s1] sm:$0xff]  }
   0x3   :  { %160 = vmatprep.subr.bf16.mxu0 %v177_v0  ;;  %v176_v5 = vld [vmem:[%s228_s0] sm:$0xff]  }
   0x4   :  { %v148_v14 = vld [vmem:[%s229_s2] ss:$0 sm:$0xff] }
   0x6   :  { %161 = vmatpush3.bf16.msra.mxu0 %v173_v2 }
   0x7   :  { %162 = vmatprep.subr.bf16.mxu0 %v177_v0 }
   0x8   :  { %v22_v6 = vld [vmem:[#allocation2] sm:$0xff]  ;;  %v23_v10 = vld [vmem:[#allocation2 + $0x8] sm:$0xff] }
   0xa   :  { %163 = vmatpush3.bf16.msra.mxu0 %v174_v3 }
   0xb   :  { %164 = vmatprep.subr.bf16.mxu0 %v177_v0 }
   0xe   :  { %165 = vmatpush3.bf16.msra.mxu0 %v175_v4 }
  0x11   :  { %167 = vmatmul.mubr.msk.bf16.vlgmr.msra.gmra.mxu0 %vm63_vm2, %v176_v5 }
  0xd1   :  { %v101_v7 = vpop.f32.mrf.mxu0 }
  0xd2   :  { %v108_v8 = vadd.f32 %v101_v7, %v22_v6 }
  0xd3   :  { %v168_v9 = vpop.f32.mrf.mxu0 }
  0xd4   :  { %111 = vst.msk [vmem:[#allocation2] sm:$0xff] %vm19_vm0, %v108_v8 }
  0xd5   :  { %v104_v11 = vpop.f32.mrf.mxu0 }
  0xd6   :  { %v109_v12 = vadd.f32 %v104_v11, %v23_v10 }
  0xd7   :  { %v169_v13 = vpop.f32.mrf.mxu0 }
  0xd8   :  { %112 = vst.msk [vmem:[#allocation2 + $0x8] sm:$0xff] %vm19_vm0, %v109_v12 }
  0xdb   :  { %v116_v15 = vld [vmem:[#allocation2] sm:$0xff] }
  0xdc   :  { %v125_v16 = vadd.f32 %v148_v14, %v116_v15 }
  0xde   :  { %v151_v17 = vpack.c.bf16 %v125_v16, %v125_v16 }
  0xdf   :  { %v117_v18 = vld [vmem:[#allocation2 + $0x8] sm:$0xff] }
  0xe0   :  { %136 = vst.msk [vmem:[%s230_s3] sm:$0xf] %vm135_vm3, %v151_v17  ;;  %v126_v19 = vadd.f32 %v148_v14, %v117_v18 }
  0xe2   :  { %v152_v20 = vpack.c.bf16 %v126_v19, %v126_v19 }
  0xe4   :  { %137 = vst.msk [vmem:[%s230_s3 + $0x4] sm:$0xf] %vm135_vm3, %v152_v20 }

// kernel: run.31
= control target key start
LH: loop header
LB: loop body
LE: loop exit
PB: predicated region body
PF: predicated region fallthrough
CT: control target
= control target key end

     0   :  { %vm18_vm0 = vcmask 261120   ;;  %vm72_vm1 = vcmask 257024   ;;  %s132_s0 = inlined_call_operand.vmem [shape: bf16[16,32], index: 0, kind: input, shape index: {}]   ;;  %s133_s1 = inlined_call_operand.vmem [shape: f32[1,32], index: 1, kind: input, shape index: {}]   ;;  %s134_s2 = inlined_call_operand.vmem [shape: f32[1,32], index: 2, kind: input, shape index: {}]   ;;  %s135_s3 = inlined_call_operand.vmem [shape: bf16[16,32], index: 3, kind: output, shape index: {}]  }
   0x1   :  { %v86_v0 = vld [vmem:[%s132_s0] sm:$0xff]  }
   0x2   :  { %v87_v1 = vunpack.c.l.bf16 %v86_v0  ;;  %v88_v2 = vunpack.c.h.bf16 %v86_v0  ;;  %v79_v22 = vld [vmem:[%s133_s1] ss:$0 sm:$0xff] }
   0x3   :  { %v80_v24 = vld [vmem:[%s134_s2] ss:$0 sm:$0xff] }
   0x4   :  { %v19_v3 = vsel %vm18_vm0, %v87_v1, 0.0  ;;  %v22_v4 = vsel %vm18_vm0, %v88_v2, 0.0 }
   0x5   :  { %20 = vadd.xlane.f32.xlu0 %v19_v3 }
   0x9   :  { %23 = vadd.xlane.f32.xlu0 %v22_v4 }
  0x8e   :  { %v21_v5 = vpop.xlane.xlu0 %20 }
  0x8f   :  { %v26_v6 = vmul.f32 0.03125, %v21_v5 }
  0x91   :  { %v28_v7 = vsub.f32 %v87_v1, %v26_v6 }
  0x92   :  { %v24_v8 = vpop.xlane.xlu0 %23 }
  0x93   :  { %v27_v9 = vmul.f32 0.03125, %v24_v8  ;;  %v30_v10 = vmul.f32 %v28_v7, %v28_v7 }
  0x95   :  { %v29_v11 = vsub.f32 %v88_v2, %v27_v9  ;;  %v32_v12 = vsel %vm18_vm0, %v30_v10, 0.0 }
  0x96   :  { %33 = vadd.xlane.f32.xlu1 %v32_v12 }
  0x97   :  { %v31_v13 = vmul.f32 %v29_v11, %v29_v11 }
  0x99   :  { %v35_v14 = vsel %vm18_vm0, %v31_v13, 0.0 }
  0x9a   :  { %36 = vadd.xlane.f32.xlu1 %v35_v14 }
 0x11f   :  { %v34_v15 = vpop.xlane.xlu1 %33 }
 0x120   :  { %v38_v16 = vmul.f32 0.03125, %v34_v15 }
 0x122   :  { %v40_v17 = vadd.f32 1e-05, %v38_v16 }
 0x123   :  { %v37_v18 = vpop.xlane.xlu1 %36 }
 0x124   :  { %89 = vrsqrt.f32 %v40_v17  ;;  %v39_v19 = vmul.f32 0.03125, %v37_v18 }
 0x126   :  { %v41_v20 = vadd.f32 1e-05, %v39_v19 }
 0x128   :  { %91 = vrsqrt.f32 %v41_v20 }
 0x131   :  { %v90_v21 = vpop.eup %89 }
 0x132   :  { %v44_v23 = vmul.f32 %v90_v21, %v28_v7 }
 0x134   :  { %v53_v25 = vmul.f32 %v79_v22, %v44_v23 }
 0x135   :  { %v92_v26 = vpop.eup %91 }
 0x136   :  { %v62_v27 = vadd.f32 %v80_v24, %v53_v25  ;;  %v45_v28 = vmul.f32 %v92_v26, %v29_v11 }
 0x138   :  { %v83_v29 = vpack.c.bf16 %v62_v27, %v62_v27  ;;  %v54_v30 = vmul.f32 %v79_v22, %v45_v28 }
 0x13a   :  { %73 = vst.msk [vmem:[%s135_s3] sm:$0xf] %vm72_vm1, %v83_v29  ;;  %v63_v31 = vadd.f32 %v80_v24, %v54_v30 }
 0x13c   :  { %v84_v32 = vpack.c.bf16 %v63_v31, %v63_v31 }
 0x13e   :  { %74 = vst.msk [vmem:[%s135_s3 + $0x4] sm:$0xf] %vm72_vm1, %v84_v32 }

// kernel: run.32
= control target key start
LH: loop header
LB: loop body
LE: loop exit
PB: predicated region body
PF: predicated region fallthrough
CT: control target
= control target key end

     0   :  { %vm19_vm0 = vcmask 326656   ;;  %v138_v0 = vmov 0.0   ;;  %vm139_vm1 = vmmov 0   ;;  %vm47_vm2 = vcmask 261120   ;;  %s184_s1 = inlined_call_operand.vmem [shape: bf16[32,40], index: 1, kind: input, shape index: {}]   ;;  %s185_s0 = inlined_call_operand.vmem [shape: bf16[16,32], index: 0, kind: input, shape index: {}]   ;;  %s186_s2 = inlined_call_operand.vmem [shape: f32[1,40], index: 2, kind: input, shape index: {}]   ;;  %s187_s3 = inlined_call_operand.vmem [shape: f32[16,40], index: 3, kind: output, shape index: {}]  }
   0x1   :  { %125 = vmatprep.subr.bf16.mxu0 %v138_v0  ;;  %v135_v1 = vld [vmem:[%s184_s1 + $0x8] sm:$0xff]   ;;  %129 = vmatprep.mubr.msk.bf16.mxu0 %vm139_vm1, %v138_v0  ;;  %20 = vst.msk [vmem:[#allocation2] sm:$0xff] %vm19_vm0, %v138_v0  ;;  %21 = vst.msk [vmem:[#allocation2 + $0x8] sm:$0xff] %vm19_vm0, %v138_v0  ;;  %v136_v2 = vld [vmem:[%s184_s1] sm:$0xff]  }
   0x2   :  { %126 = vmatpush3.bf16.msra.mxu0 %v135_v1  ;;  %v137_v3 = vld [vmem:[%s185_s0] sm:$0xff]  }
   0x3   :  { %127 = vmatprep.subr.bf16.mxu0 %v138_v0  ;;  %v121_v12 = vld [vmem:[%s186_s2] ss:$0 sm:$0xff] }
   0x6   :  { %128 = vmatpush3.bf16.msra.mxu0 %v136_v2 }
   0x8   :  { %v22_v4 = vld [vmem:[#allocation2] sm:$0xff]  ;;  %v23_v8 = vld [vmem:[#allocation2 + $0x8] sm:$0xff] }
   0x9   :  { %130 = vmatmul.mubr.msk.bf16.vlgmr.msra.gmra.mxu0 %vm47_vm2, %v137_v3 }
  0xc9   :  { %v85_v5 = vpop.f32.mrf.mxu0 }
  0xca   :  { %v92_v6 = vadd.f32 %v85_v5, %v22_v4 }
  0xcb   :  { %v131_v7 = vpop.f32.mrf.mxu0 }
  0xcc   :  { %95 = vst.msk [vmem:[#allocation2] sm:$0xff] %vm19_vm0, %v92_v6 }
  0xcd   :  { %v88_v9 = vpop.f32.mrf.mxu0 }
  0xce   :  { %v93_v10 = vadd.f32 %v88_v9, %v23_v8 }
  0xcf   :  { %v132_v11 = vpop.f32.mrf.mxu0 }
  0xd0   :  { %96 = vst.msk [vmem:[#allocation2 + $0x8] sm:$0xff] %vm19_vm0, %v93_v10 }
  0xd3   :  { %v100_v13 = vld [vmem:[#allocation2] sm:$0xff] }
  0xd4   :  { %v109_v14 = vadd.f32 %v121_v12, %v100_v13 }
  0xd6   :  { %111 = vst.msk [vmem:[%s187_s3] sm:$0xff] %vm19_vm0, %v109_v14 }
  0xd7   :  { %v101_v15 = vld [vmem:[#allocation2 + $0x8] sm:$0xff] }
  0xd8   :  { %v110_v16 = vadd.f32 %v121_v12, %v101_v15 }
  0xda   :  { %112 = vst.msk [vmem:[%s187_s3 + $0x8] sm:$0xff] %vm19_vm0, %v110_v16 }

// kernel: run.33
= control target key start
LH: loop header
LB: loop body
LE: loop exit
PB: predicated region body
PF: predicated region fallthrough
CT: control target
= control target key end

     0   :  { %9 = vsyncpa [#allocation3], 0  ;;  %vm26_vm0 = vcmask 326656   ;;  %v205_v4 = vmov 0   ;;  %s261_s0 = inlined_call_operand.vmem [shape: f32[16,40], index: 0, kind: input, shape index: {}]   ;;  %s262_s1 = inlined_call_operand.vmem [shape: s32[16,1], index: 1, kind: input, shape index: {}]   ;;  %s263_s2 = inlined_call_operand.hbm [shape: f32[1,1], index: 2, kind: output, shape index: {0}]   ;;  %s264_s3 = inlined_call_operand.hbm [shape: f32[1,1], index: 3, kind: output, shape index: {1}]  }
   0x1   :  { %v22_v0 = vld [vmem:[%s261_s0] sm:$0xff]  ;;  %v23_v1 = vld [vmem:[%s261_s0 + $0x8] sm:$0xff]  ;;  %151 = vset.pattern.permute.xlu1 %v205_v4  ;;  %152 = vset.pattern.permute.xlu0 %v205_v4 }
   0x2   :  { %v24_v2 = vld [vmem:[%s262_s1] sm:$0xff]  ;;  %v27_v3 = vsel %vm26_vm0, %v22_v0, -inf }
   0x3   :  { %10 = vsyncpa [#allocation5], 0  ;;  %28 = vmax.xlane.f32.xlu0 %v27_v3  ;;  %54 = vperm.xlu1 %151, %v24_v2   ;;  %v30_v5 = vsel %vm26_vm0, %v23_v1, -inf  ;;  %v25_v6 = vld [vmem:[%s262_s1 + $0x8] sm:$0xff]  ;;  %v51_v13 = vlaneseq  ;;  %vm69_vm3 = vcmp.ne.s32.totalorder %v24_v2, 0  ;;  %v206_v25 = vmov 0.0  }
   0x4   :  { %vm70_vm4 = vcmp.ne.s32.totalorder %v25_v6, 0  ;;  %v141_v26 = vsel %vm69_vm3, 1.0, %v206_v25  ;;  %vm80_vm5 = vcmask 7168   ;;  %vm19_vm6 = vcmask 0   ;;  %s207_s0 = smov [#allocation2]   ;;  %s208_s21 = smov [#allocation4]  }
   0x5   :  { %v52_v15 = vand.u32 127, %v51_v13  ;;  %v142_v27 = vsel %vm70_vm4, 1.0, %v206_v25  ;;  %v98_v28 = vsel %vm80_vm5, %v141_v26, 0.0  ;;  %20 = vst.msk [vmem:[#allocation2] sm:$0x1] %vm19_vm6, %v206_v25  ;;  %s119_s1 = sshll.u32 %s207_s0, 4  ;;  %s120_s1 = int_to_ptr.vmem [resolvable:$true] %s119_s1 }
   0x6   :  { %v99_v29 = vsel %vm80_vm5, %v142_v27, 0.0  ;;  %21 = vst.msk [vmem:[#allocation4] sm:$0x1] %vm19_vm6, %v206_v25  ;;  %s129_s22 = sshll.u32 %s208_s21, 4  ;;  %s161_s24 = scalar_lea.vmem %s120_s1, 16  ;;  %s130_s22 = int_to_ptr.vmem [resolvable:$true] %s129_s22 }
   0x7   :  { %31 = vmax.xlane.f32.xlu0 %v30_v5  ;;  %57 = vperm.xlu1 %151, %v25_v6   ;;  %v100_v30 = vadd.f32 %v99_v29, %v98_v28  ;;  %p162_p0 = scmp.ne.s32.totalorder %s120_s1, %s161_s24  ;;  %s165_s25 = scalar_lea.vmem %s120_s1, 32 }
   0x8   :  { %p166_p1 = scmp.lt.s32.totalorder %s120_s1, %s120_s1  ;;  %p167_p2 = scmp.lt.s32.totalorder %s165_s25, %s161_s24 }
   0xa   :  { %p168_p3 = por %p167_p2, %p166_p1 }
   0xc   :  { %v75_v62 = vld [vmem:[#allocation2] sm:$0x1]  ;;  %p169_p4 = pnand %p168_p3, %p162_p0 }
  0x7e   :  { %v55_v14 = vpop.permute.xlu1 %54 }
  0x7f   :  { %vm59_vm1 = vcmp.eq.s32.totalorder %v52_v15, %v55_v14 }
  0x80   :  { %v61_v18 = vsel %vm59_vm1, %v22_v0, 0.0 }
  0x81   :  { %v63_v20 = vsel %vm26_vm0, %v61_v18, 0.0 }
  0x82   :  { %v58_v16 = vpop.permute.xlu1 %57 }
  0x83   :  { %vm60_vm2 = vcmp.eq.s32.totalorder %v52_v15, %v58_v16 }
  0x84   :  { %v62_v22 = vsel %vm60_vm2, %v23_v1, 0.0 }
  0x85   :  { %v66_v24 = vsel %vm26_vm0, %v62_v22, 0.0 }
  0x8c   :  { %v29_v7 = vpop.xlane.xlu0 %28 }
  0x8d   :  { %v33_v8 = vsub.f32 %v22_v0, %v29_v7 }
  0x8f   :  { %v35_v9 = vmul.f32 1.442695, %v33_v8 }
  0x90   :  { %v32_v10 = vpop.xlane.xlu0 %31 }
  0x91   :  { %153 = vpow2.f32 %v35_v9  ;;  %v34_v11 = vsub.f32 %v23_v1, %v32_v10  ;;  %v97_v1 = vld [vmem:[#allocation4] sm:$0x1] }
  0x93   :  { %v37_v12 = vmul.f32 1.442695, %v34_v11 }
  0x95   :  { %155 = vpow2.f32 %v37_v12 }
  0x9e   :  { %v154_v17 = vpop.eup %153 }
  0x9f   :  { %v39_v19 = vsel %vm26_vm0, %v154_v17, 0.0 }
  0xa0   :  { %40 = vadd.xlane.f32.xlu0 %v39_v19 }
  0xa2   :  { %v156_v21 = vpop.eup %155 }
  0xa3   :  { %v42_v23 = vsel %vm26_vm0, %v156_v21, 0.0 }
  0xa4   :  { %43 = vadd.xlane.f32.xlu1 %v42_v23  ;;  %64 = vadd.xlane.f32.xlu0 %v63_v20 }
  0xa8   :  { %67 = vadd.xlane.f32.xlu0 %v66_v24 }
 0x129   :  { %v41_v31 = vpop.xlane.xlu0 %40 }
 0x12a   :  { %157 = vlog2.f32 %v41_v31 }
 0x12d   :  { %v44_v32 = vpop.xlane.xlu1 %43  ;;  %v65_v35 = vpop.xlane.xlu0 %64 }
 0x12e   :  { %159 = vlog2.f32 %v44_v32 }
 0x131   :  { %v68_v41 = vpop.xlane.xlu0 %67 }
 0x137   :  { %v158_v33 = vpop.eup %157 }
 0x138   :  { %v46_v34 = vmul.f32 0.6931472, %v158_v33 }
 0x13a   :  { %v49_v36 = vadd.f32 %v46_v34, %v29_v7 }
 0x13b   :  { %v160_v37 = vpop.eup %159 }
 0x13c   :  { %v48_v38 = vmul.f32 0.6931472, %v160_v37  ;;  %v76_v39 = vsub.f32 %v49_v36, %v65_v35 }
 0x13e   :  { %v50_v40 = vadd.f32 %v48_v38, %v32_v10  ;;  %v78_v42 = vmul.f32 %v141_v26, %v76_v39 }
 0x140   :  { %v77_v43 = vsub.f32 %v50_v40, %v68_v41  ;;  %v81_v45 = vsel %vm80_vm5, %v78_v42, 0.0 }
 0x142   :  { %v79_v44 = vmul.f32 %v142_v27, %v77_v43 }
 0x144   :  { %v82_v46 = vsel %vm80_vm5, %v79_v44, 0.0 }
 0x145   :  { %v83_v47 = vadd.f32 %v82_v46, %v81_v45 }
 0x147   :  { %84 = vadd.xlane.f32.xlu0 %v83_v47 }
 0x14b   :  { %101 = vadd.xlane.f32.xlu0 %v100_v30 }
 0x1d0   :  { %v85_v48 = vpop.xlane.xlu0 %84 }
 0x1d1   :  { %v86_v49 = vrot.slane %v85_v48, 4 }
 0x1d3   :  { %v87_v50 = vadd.f32 %v86_v49, %v85_v48 }
 0x1d4   :  { %v102_v51 = vpop.xlane.xlu0 %101 }
 0x1d5   :  { %v88_v52 = vrot.slane %v87_v50, 2  ;;  %v103_v53 = vrot.slane %v102_v51, 4 }
 0x1d7   :  { %v104_v54 = vadd.f32 %v103_v53, %v102_v51  ;;  %v89_v55 = vadd.f32 %v88_v52, %v87_v50 }
 0x1d9   :  { %v105_v56 = vrot.slane %v104_v54, 2  ;;  %v90_v57 = vrot.slane %v89_v55, 1 }
 0x1db   :  { %v106_v58 = vadd.f32 %v105_v56, %v104_v54  ;;  %v91_v59 = vadd.f32 %v90_v57, %v89_v55 }
 0x1dd   :  { %143 = vpush %v91_v59  ;;  %v107_v60 = vrot.slane %v106_v58, 1 }
 0x1df   :  { %v108_v61 = vadd.f32 %v107_v60, %v106_v58 }
 0x1e1   :  { %145 = vpush %v108_v61 }
 0x20e   :  { %s144_s20 = spop %143 }
 0x20f   :  { %v93_v63 = vstv %s144_s20 }
 0x210   :  { %v94_v0 = vadd.f32 %v93_v63, %v75_v62 }
 0x212   :  { %96 = vst.msk [vmem:[#allocation2] sm:$0x1] %vm19_vm6, %v94_v0  ;;  %s146_s23 = spop %145 }
 0x213   :  { %v110_v2 = vstv %s146_s23 }
 0x214   :  { %172 = shalt.err (!%p169_p4)
}
 0x215   :  { %122 = dma.vmem_to_hbm [thread:$0]  %s120_s1, 16, %s263_s2, [#allocation3]   ;;  %v111_v3 = vadd.f32 %v110_v2, %v97_v1 }
 0x216   :  { %s181_s28 = scalar_lea.vmem %s130_s22, 16  ;;  %s185_s29 = scalar_lea.vmem %s130_s22, 32 }
 0x217   :  { %112 = vst.msk [vmem:[#allocation4] sm:$0x1] %vm19_vm6, %v111_v3  ;;  %p182_p5 = scmp.ne.s32.totalorder %s130_s22, %s181_s28  ;;  %p186_p6 = scmp.lt.s32.totalorder %s130_s22, %s130_s22 }
 0x218   :  { %p187_p7 = scmp.lt.s32.totalorder %s185_s29, %s181_s28 }
 0x21a   :  { %p188_p8 = por %p187_p7, %p186_p6 }
 0x21c   :  { %p189_p9 = pnand %p188_p8, %p182_p5 }
 0x21e   :  { %192 = shalt.err (!%p189_p9)
}
 0x21f   :  { %132 = dma.vmem_to_hbm [thread:$0]  %s130_s22, 16, %s264_s3, [#allocation5]  }
 0x220   :  { %201 = dma.done.wait [#allocation3], 16  }
 0x221   :  { %202 = vsyncadd [#allocation3], 4294967280 }
 0x222   :  { %203 = dma.done.wait [#allocation5], 16  }
 0x223   :  { %204 = vsyncadd [#allocation5], 4294967280 }
 0x224   :  { %139 = vsyncpa [#allocation3], 1 }
 0x225   :  { %140 = vsyncpa [#allocation5], 1 }

</bundles_post_ra>
